<compile_context>
chip_gen: v6e
topology: v6e:2x2x1
jax: 0.10.0
libtpu: 0.0.40
codegen_flags: <defaults>
</compile_context>

<pallas_src>
import functools
import math

import jax
import jax.numpy as jnp
from jax.experimental import pallas as pl
from jax.experimental.pallas import tpu as pltpu

_MXU_DTYPE = jnp.bfloat16   # matmul operand dtype (f32 accumulate)
_LN_EPS = 1e-5


def _tile(dim, pref):
    """Largest tile <= pref that exactly divides dim (full dim if small)."""
    if dim <= pref:
        return dim
    for t in (pref, 512, 256, 128, 64, 32, 16, 8):
        if t <= pref and dim % t == 0:
            return t
    return dim


# --------------------------------------------------------------------------
# Tiled linear:  y = x @ w + b   (w stored as (Din, Dout), i.e. torch W.T)
# --------------------------------------------------------------------------
def _linear_kernel(x_ref, w_ref, b_ref, o_ref, acc_ref, *, activation):
    k = pl.program_id(2)

    @pl.when(k == 0)
    def _():
        acc_ref[...] = jnp.zeros_like(acc_ref)

    acc_ref[...] += jnp.dot(
        x_ref[...].astype(_MXU_DTYPE),
        w_ref[...].astype(_MXU_DTYPE),
        preferred_element_type=jnp.float32,
    )

    @pl.when(k == pl.num_programs(2) - 1)
    def _():
        y = acc_ref[...] + b_ref[...]
        if activation == "relu":
            y = jnp.maximum(y, 0.0)
        o_ref[...] = y.astype(o_ref.dtype)


def linear(x, w, b, activation=None, tm=256, tn=256, tk=512):
    M, K = x.shape
    N = w.shape[1]
    bm, bn, bk = _tile(M, tm), _tile(N, tn), _tile(K, tk)
    grid = (M // bm, N // bn, K // bk)
    return pl.pallas_call(
        functools.partial(_linear_kernel, activation=activation),
        out_shape=jax.ShapeDtypeStruct((M, N), jnp.float32),
        grid=grid,
        in_specs=[
            pl.BlockSpec((bm, bk), lambda i, j, k: (i, k)),
            pl.BlockSpec((bk, bn), lambda i, j, k: (k, j)),
            pl.BlockSpec((1, bn), lambda i, j, k: (0, j)),
        ],
        out_specs=pl.BlockSpec((bm, bn), lambda i, j, k: (i, j)),
        scratch_shapes=[pltpu.VMEM((bm, bn), jnp.float32)],
        compiler_params=pltpu.CompilerParams(
            dimension_semantics=("parallel", "parallel", "arbitrary")
        ),
    )(x, w, b.reshape(1, N))


# --------------------------------------------------------------------------
# Attention core: one grid step per batch element, all heads batched.
# --------------------------------------------------------------------------
def _attn_kernel(q_ref, k_ref, v_ref, m_ref, o_ref, *prob_refs, inv_scale):
    H, Lq, Dh = q_ref.shape[1], q_ref.shape[2], q_ref.shape[3]
    Lk = k_ref.shape[2]

    q = q_ref[...].reshape(H, Lq, Dh) * inv_scale      # fold 1/sqrt(Dh) into q
    k = k_ref[...].reshape(H, Lk, Dh)
    v = v_ref[...].reshape(H, Lk, Dh)
    m = m_ref[...].reshape(Lq, Lk)                     # (B,1,Lq,Lk) block

    energy = jnp.einsum(
        "hqd,hkd->hqk",
        q.astype(_MXU_DTYPE), k.astype(_MXU_DTYPE),
        preferred_element_type=jnp.float32,
    )                                                  # (H, Lq, Lk)
    energy = jnp.where(m == 0.0, -1e10, energy)        # broadcast over heads

    emax = jnp.max(energy, axis=-1, keepdims=True)
    p = jnp.exp(energy - emax)
    p = p * pl.reciprocal(jnp.sum(p, axis=-1, keepdims=True))   # softmax (f32)

    if prob_refs:                                      # only last-layer cross-attn
        prob_refs[0][...] = p.reshape(prob_refs[0].shape)

    out = jnp.einsum(
        "hqk,hkd->hqd",
        p.astype(_MXU_DTYPE), v.astype(_MXU_DTYPE),
        preferred_element_type=jnp.float32,
    )                                                  # (H, Lq, Dh)
    o_ref[...] = out.reshape(o_ref.shape)


def attention_core(q, k, v, mask, inv_scale, return_probs):
    B, H, Lq, Dh = q.shape
    Lk = k.shape[2]
    # keep the head dim un-broadcast; only expand the (possibly size-1) Lq dim
    mask = jnp.broadcast_to(mask, (B, 1, Lq, Lk)).astype(jnp.float32)

    in_specs = [
        pl.BlockSpec((1, H, Lq, Dh), lambda b: (b, 0, 0, 0)),
        pl.BlockSpec((1, H, Lk, Dh), lambda b: (b, 0, 0, 0)),
        pl.BlockSpec((1, H, Lk, Dh), lambda b: (b, 0, 0, 0)),
        pl.BlockSpec((1, 1, Lq, Lk), lambda b: (b, 0, 0, 0)),
    ]
    kern = functools.partial(_attn_kernel, inv_scale=inv_scale)
    cp = pltpu.CompilerParams(dimension_semantics=("parallel",))

    if return_probs:
        out, probs = pl.pallas_call(
            kern,
            out_shape=(
                jax.ShapeDtypeStruct((B, H, Lq, Dh), jnp.float32),
                jax.ShapeDtypeStruct((B, H, Lq, Lk), jnp.float32),
            ),
            grid=(B,),
            in_specs=in_specs,
            out_specs=(
                pl.BlockSpec((1, H, Lq, Dh), lambda b: (b, 0, 0, 0)),
                pl.BlockSpec((1, H, Lq, Lk), lambda b: (b, 0, 0, 0)),
            ),
            compiler_params=cp,
        )(q, k, v, mask)
        return out, probs

    out = pl.pallas_call(
        kern,
        out_shape=jax.ShapeDtypeStruct((B, H, Lq, Dh), jnp.float32),
        grid=(B,),
        in_specs=in_specs,
        out_specs=pl.BlockSpec((1, H, Lq, Dh), lambda b: (b, 0, 0, 0)),
        compiler_params=cp,
    )(q, k, v, mask)
    return out, None


# --------------------------------------------------------------------------
# Fused (output-projection + residual-add + LayerNorm)
# --------------------------------------------------------------------------
def _proj_add_ln_kernel(x_ref, w_ref, b_ref, r_ref, g_ref, be_ref, o_ref, *, eps):
    y = jnp.dot(
        x_ref[...].astype(_MXU_DTYPE), w_ref[...].astype(_MXU_DTYPE),
        preferred_element_type=jnp.float32,
    ) + b_ref[...]
    s = r_ref[...] + y
    mu = jnp.mean(s, axis=-1, keepdims=True)
    var = jnp.mean((s - mu) * (s - mu), axis=-1, keepdims=True)
    o_ref[...] = (s - mu) * jax.lax.rsqrt(var + eps) * g_ref[...] + be_ref[...]


def proj_add_ln(x2d, w, b, resid3d, gamma, beta, eps=_LN_EPS):
    B, L, D = resid3d.shape
    M = B * L
    bm = _tile(M, 256)
    out = pl.pallas_call(
        functools.partial(_proj_add_ln_kernel, eps=eps),
        out_shape=jax.ShapeDtypeStruct((M, D), jnp.float32),
        grid=(M // bm,),
        in_specs=[
            pl.BlockSpec((bm, D), lambda i: (i, 0)),
            pl.BlockSpec((D, D), lambda i: (0, 0)),
            pl.BlockSpec((1, D), lambda i: (0, 0)),
            pl.BlockSpec((bm, D), lambda i: (i, 0)),
            pl.BlockSpec((1, D), lambda i: (0, 0)),
            pl.BlockSpec((1, D), lambda i: (0, 0)),
        ],
        out_specs=pl.BlockSpec((bm, D), lambda i: (i, 0)),
        compiler_params=pltpu.CompilerParams(dimension_semantics=("parallel",)),
    )(x2d, w, b.reshape(1, D), resid3d.reshape(M, D),
      gamma.reshape(1, D), beta.reshape(1, D))
    return out.reshape(B, L, D)


# --------------------------------------------------------------------------
# Fused FFN (w1 -> relu -> w2) + residual-add + LayerNorm
# --------------------------------------------------------------------------
def _ffn_add_ln_kernel(x_ref, w1_ref, b1_ref, w2_ref, b2_ref, g_ref, be_ref,
                       o_ref, *, eps):
    x = x_ref[...]
    h = jnp.dot(
        x.astype(_MXU_DTYPE), w1_ref[...].astype(_MXU_DTYPE),
        preferred_element_type=jnp.float32,
    ) + b1_ref[...]
    h = jnp.maximum(h, 0.0)
    y = jnp.dot(
        h.astype(_MXU_DTYPE), w2_ref[...].astype(_MXU_DTYPE),
        preferred_element_type=jnp.float32,
    ) + b2_ref[...]
    s = x + y
    mu = jnp.mean(s, axis=-1, keepdims=True)
    var = jnp.mean((s - mu) * (s - mu), axis=-1, keepdims=True)
    o_ref[...] = (s - mu) * jax.lax.rsqrt(var + eps) * g_ref[...] + be_ref[...]


def ffn_add_ln(x, p, gamma, beta, eps=_LN_EPS):
    B, L, D = x.shape
    F = p["w1"].shape[1]
    M = B * L
    bm = _tile(M, 256)
    out = pl.pallas_call(
        functools.partial(_ffn_add_ln_kernel, eps=eps),
        out_shape=jax.ShapeDtypeStruct((M, D), jnp.float32),
        grid=(M // bm,),
        in_specs=[
            pl.BlockSpec((bm, D), lambda i: (i, 0)),
            pl.BlockSpec((D, F), lambda i: (0, 0)),
            pl.BlockSpec((1, F), lambda i: (0, 0)),
            pl.BlockSpec((F, D), lambda i: (0, 0)),
            pl.BlockSpec((1, D), lambda i: (0, 0)),
            pl.BlockSpec((1, D), lambda i: (0, 0)),
            pl.BlockSpec((1, D), lambda i: (0, 0)),
        ],
        out_specs=pl.BlockSpec((bm, D), lambda i: (i, 0)),
        compiler_params=pltpu.CompilerParams(dimension_semantics=("parallel",)),
    )(x.reshape(M, D), p["w1"], p["b1"].reshape(1, F),
      p["w2"], p["b2"].reshape(1, D),
      gamma.reshape(1, D), beta.reshape(1, D))
    return out.reshape(B, L, D)


# --------------------------------------------------------------------------
# Model glue
# --------------------------------------------------------------------------
def self_attention(x, mask, p, n_heads):
    B, L, D = x.shape
    H, Dh = n_heads, D // n_heads
    qkv = linear(x.reshape(B * L, D), p["wqkv"], p["bqkv"])       # fused Q|K|V
    qkv = qkv.reshape(B, L, 3, H, Dh).transpose(2, 0, 3, 1, 4)    # (3,B,H,L,Dh)
    ctx, _ = attention_core(qkv[0], qkv[1], qkv[2], mask,
                            1.0 / math.sqrt(Dh), return_probs=False)
    return ctx.transpose(0, 2, 1, 3).reshape(B * L, D)


def cross_attention(x_q, x_kv, mask, p, n_heads, return_probs):
    B, Lq, D = x_q.shape
    Lk = x_kv.shape[1]
    H, Dh = n_heads, D // n_heads
    q = linear(x_q.reshape(B * Lq, D), p["wq"], p["bq"])
    q = q.reshape(B, Lq, H, Dh).transpose(0, 2, 1, 3)             # (B,H,Lq,Dh)
    kv = linear(x_kv.reshape(B * Lk, D), p["wkv"], p["bkv"])      # fused K|V
    kv = kv.reshape(B, Lk, 2, H, Dh).transpose(2, 0, 3, 1, 4)     # (2,B,H,Lk,Dh)
    ctx, attn = attention_core(q, kv[0], kv[1], mask,
                               1.0 / math.sqrt(Dh), return_probs)
    return ctx.transpose(0, 2, 1, 3).reshape(B * Lq, D), attn


def decoder_layer(trg, enc_src, trg_mask, src_mask, p, n_heads, need_attn):
    # self-attention -> fused (out-proj + residual + LayerNorm)
    ctx = self_attention(trg, trg_mask, p["self_attn"], n_heads)
    trg = proj_add_ln(ctx, p["self_attn"]["wo"], p["self_attn"]["bo"],
                      trg, p["ln1_g"], p["ln1_b"])
    # cross-attention -> fused (out-proj + residual + LayerNorm)
    ctx, attention = cross_attention(trg, enc_src, src_mask,
                                     p["enc_attn"], n_heads, need_attn)
    trg = proj_add_ln(ctx, p["enc_attn"]["wo"], p["enc_attn"]["bo"],
                      trg, p["ln2_g"], p["ln2_b"])
    # fused FFN + residual + LayerNorm
    trg = ffn_add_ln(trg, p["ffn"], p["ln3_g"], p["ln3_b"])
    return trg, attention


def decoder_forward(trg_tokens, enc_src, trg_mask, src_mask, params,
                    n_heads, output_dim):
    B, Lt = trg_tokens.shape
    D = params["tok_emb"].shape[1]
    emb_scale = jnp.sqrt(jnp.float32(D))

    # embedding gather + positional add stay in plain JAX (glue).
    pos = jnp.arange(Lt)
    x = params["tok_emb"][trg_tokens] * emb_scale + params["pos_emb"][pos][None]

    n_layers = len(params["layers"])
    attention = None
    for li, lp in enumerate(params["layers"]):
        need_attn = li == n_layers - 1        # probs only kept from last layer
        x, attn = decoder_layer(x, enc_src, trg_mask, src_mask, lp,
                                n_heads, need_attn)
        if need_attn:
            attention = attn

    # fc_out over vocab padded to a 128-lane multiple; slice back to output_dim.
    logits = linear(x.reshape(B * Lt, D), params["w_out"], params["b_out"])
    logits = logits[:, :output_dim].reshape(B, Lt, output_dim)
    return logits, attention


# --------------------------------------------------------------------------
# Deterministic parameter construction
# --------------------------------------------------------------------------
def init_params(key, output_dim, hid_dim, n_layers, pf_dim, max_length=350):
    def nxt():
        nonlocal key
        key, sub = jax.random.split(key)
        return sub

    def lin(din, dout):
        w = 0.02 * jax.random.normal(nxt(), (din, dout), jnp.float32)
        b = 0.02 * jax.random.normal(nxt(), (dout,), jnp.float32)
        return w, b

    def self_attn_params(d):
        wq, bq = lin(d, d)
        wk, bk = lin(d, d)
        wv, bv = lin(d, d)
        wo, bo = lin(d, d)
        return dict(wqkv=jnp.concatenate([wq, wk, wv], axis=1),
                    bqkv=jnp.concatenate([bq, bk, bv]),
                    wo=wo, bo=bo)

    def cross_attn_params(d):
        wq, bq = lin(d, d)
        wk, bk = lin(d, d)
        wv, bv = lin(d, d)
        wo, bo = lin(d, d)
        return dict(wq=wq, bq=bq,
                    wkv=jnp.concatenate([wk, wv], axis=1),
                    bkv=jnp.concatenate([bk, bv]),
                    wo=wo, bo=bo)

    params = dict(
        tok_emb=0.02 * jax.random.normal(nxt(), (output_dim, hid_dim), jnp.float32),
        pos_emb=0.02 * jax.random.normal(nxt(), (max_length, hid_dim), jnp.float32),
        layers=[],
    )
    for _ in range(n_layers):
        w1, b1 = lin(hid_dim, pf_dim)
        w2, b2 = lin(pf_dim, hid_dim)
        params["layers"].append(dict(
            self_attn=self_attn_params(hid_dim),
            enc_attn=cross_attn_params(hid_dim),
            ffn=dict(w1=w1, b1=b1, w2=w2, b2=b2),
            ln1_g=jnp.ones((hid_dim,), jnp.float32),
            ln1_b=jnp.zeros((hid_dim,), jnp.float32),
            ln2_g=jnp.ones((hid_dim,), jnp.float32),
            ln2_b=jnp.zeros((hid_dim,), jnp.float32),
            ln3_g=jnp.ones((hid_dim,), jnp.float32),
            ln3_b=jnp.zeros((hid_dim,), jnp.float32),
        ))

    # fc_out, zero-padded to a multiple of 128 output lanes (lane-dense stores)
    w_out, b_out = lin(hid_dim, output_dim)
    out_pad = ((output_dim + 127) // 128) * 128
    params["w_out"] = jnp.pad(w_out, ((0, 0), (0, out_pad - output_dim)))
    params["b_out"] = jnp.pad(b_out, (0, out_pad - output_dim))
    return params


# --------------------------------------------------------------------------
if __name__ == "__main__":
    # Small, forward-consistent shapes.
    output_dim = 50    # vocab size
    hid_dim = 32
    n_layers = 2
    n_heads = 4        # head_dim = 8
    pf_dim = 64
    batch = 2
    trg_len = 8
    src_len = 10

    key = jax.random.PRNGKey(0)
    kp, kt, ke = jax.random.split(key, 3)

    params = init_params(kp, output_dim, hid_dim, n_layers, pf_dim)

    trg_tokens = jax.random.randint(kt, (batch, trg_len), 0, output_dim)
    enc_src = jax.random.normal(ke, (batch, src_len, hid_dim), jnp.float32)

    # causal target mask (B, 1, Lt, Lt); all-ones source mask (B, 1, 1, Ls)
    trg_mask = jnp.tril(jnp.ones((trg_len, trg_len), jnp.float32))[None, None]
    trg_mask = jnp.broadcast_to(trg_mask, (batch, 1, trg_len, trg_len))
    src_mask = jnp.ones((batch, 1, 1, src_len), jnp.float32)

    fwd = jax.jit(functools.partial(decoder_forward, n_heads=n_heads,
                                    output_dim=output_dim))
    output, attention = fwd(trg_tokens, enc_src, trg_mask, src_mask,
                            params=params)
    jax.block_until_ready((output, attention))

    assert output.shape == (batch, trg_len, output_dim)
    assert attention.shape == (batch, n_heads, trg_len, src_len)
    assert bool(jnp.all(jnp.isfinite(output)))
    # attention rows must sum to 1 (softmax check)
    assert bool(jnp.allclose(attention.sum(-1), 1.0, atol=1e-5))

    print("KERNEL_OK")
</pallas_src>

<mosaic_0001>
module attributes {stable_mosaic.version = 11 : i64} {
  func.func @_linear_kernel(%arg0: i32, %arg1: i32, %arg2: i32, %arg3: memref<16x32xf32, #tpu.memory_space<vmem>>, %arg4: memref<32x32xf32, #tpu.memory_space<vmem>>, %arg5: memref<1x32xf32, #tpu.memory_space<vmem>>, %arg6: memref<16x32xf32, #tpu.memory_space<vmem>>, %arg7: memref<16x32xf32, #tpu.memory_space<vmem>>) attributes {dimension_semantics = [#tpu.dimension_semantics<parallel>, #tpu.dimension_semantics<parallel>, #tpu.dimension_semantics<arbitrary>], iteration_bounds = array<i64: 1, 1, 1>, scalar_prefetch = 0 : i64, scratch_operands = 1 : i64, tpu.core_type = #tpu.core_type<tc>, window_params = [{transform_indices = @transform_0, window_bounds = array<i64: 16, 32>}, {transform_indices = @transform_1, window_bounds = array<i64: 32, 32>}, {transform_indices = @transform_2, window_bounds = array<i64: 1, 32>}, {transform_indices = @transform_3, window_bounds = array<i64: 16, 32>}]} {
    %c0_i32 = arith.constant 0 : i32
    %0 = arith.cmpi eq, %arg2, %c0_i32 : i32
    %1 = arith.extui %0 : i1 to i32
    %c0_i32_0 = arith.constant 0 : i32
    %2 = arith.cmpi ne, %1, %c0_i32_0 : i32
    scf.if %2 {
      %cst_10 = arith.constant 0.000000e+00 : f32
      %14 = vector.broadcast %cst_10 : f32 to vector<16x32xf32>
      %c0_11 = arith.constant 0 : index
      %c0_12 = arith.constant 0 : index
      %15 = vector.load %arg7[%c0_11, %c0_12] : memref<16x32xf32, #tpu.memory_space<vmem>>, vector<16x32xf32>
      tpu.vector_store %arg7[%c0_11, %c0_12], %14 {strides = array<i32>} : memref<16x32xf32, #tpu.memory_space<vmem>>, vector<16x32xf32>,
    } else {
    }
    %c0 = arith.constant 0 : index
    %c0_1 = arith.constant 0 : index
    %3 = vector.load %arg7[%c0, %c0_1] : memref<16x32xf32, #tpu.memory_space<vmem>>, vector<16x32xf32>
    %c0_2 = arith.constant 0 : index
    %c0_3 = arith.constant 0 : index
    %4 = vector.load %arg3[%c0_2, %c0_3] : memref<16x32xf32, #tpu.memory_space<vmem>>, vector<16x32xf32>
    %5 = arith.truncf %4 : vector<16x32xf32> to vector<16x32xbf16>
    %c0_4 = arith.constant 0 : index
    %c0_5 = arith.constant 0 : index
    %6 = vector.load %arg4[%c0_4, %c0_5] : memref<32x32xf32, #tpu.memory_space<vmem>>, vector<32x32xf32>
    %7 = arith.truncf %6 : vector<32x32xf32> to vector<32x32xbf16>
    %cst = arith.constant dense<0.000000e+00> : vector<16x32xf32>
    %8 = tpu.matmul %5, %7, %cst {dimension_numbers = #tpu.dot_dimension_numbers<[1], [0], [0], [1], [0, 0, 1, 1], [], []>} : vector<16x32xbf16>, vector<32x32xbf16>, vector<16x32xf32> -> vector<16x32xf32>
    %9 = arith.addf %3, %8 : vector<16x32xf32>
    %c0_6 = arith.constant 0 : index
    %c0_7 = arith.constant 0 : index
    %10 = vector.load %arg7[%c0_6, %c0_7] : memref<16x32xf32, #tpu.memory_space<vmem>>, vector<16x32xf32>
    tpu.vector_store %arg7[%c0_6, %c0_7], %9 {strides = array<i32>} : memref<16x32xf32, #tpu.memory_space<vmem>>, vector<16x32xf32>,
    %c0_i32_8 = arith.constant 0 : i32
    %11 = arith.cmpi eq, %arg2, %c0_i32_8 : i32
    %12 = arith.extui %11 : i1 to i32
    %c0_i32_9 = arith.constant 0 : i32
    %13 = arith.cmpi ne, %12, %c0_i32_9 : i32
    scf.if %13 {
      %c0_10 = arith.constant 0 : index
      %c0_11 = arith.constant 0 : index
      %14 = vector.load %arg7[%c0_10, %c0_11] : memref<16x32xf32, #tpu.memory_space<vmem>>, vector<16x32xf32>
      %c0_12 = arith.constant 0 : index
      %c0_13 = arith.constant 0 : index
      %15 = vector.load %arg5[%c0_12, %c0_13] : memref<1x32xf32, #tpu.memory_space<vmem>>, vector<1x32xf32>
      %16 = vector.broadcast %15 : vector<1x32xf32> to vector<16x32xf32>
      %17 = arith.addf %14, %16 : vector<16x32xf32>
      %c0_14 = arith.constant 0 : index
      %c0_15 = arith.constant 0 : index
      %18 = vector.load %arg6[%c0_14, %c0_15] : memref<16x32xf32, #tpu.memory_space<vmem>>, vector<16x32xf32>
      tpu.vector_store %arg6[%c0_14, %c0_15], %17 {strides = array<i32>} : memref<16x32xf32, #tpu.memory_space<vmem>>, vector<16x32xf32>,
    } else {
    }
    return
  }
  func.func @transform_0(%arg0: i32, %arg1: i32, %arg2: i32) -> (i32, i32) {
    %c0_i32 = arith.constant 0 : i32
    return %arg0, %arg2 : i32, i32
  }
  func.func @transform_1(%arg0: i32, %arg1: i32, %arg2: i32) -> (i32, i32) {
    %c0_i32 = arith.constant 0 : i32
    return %arg2, %arg1 : i32, i32
  }
  func.func @transform_2(%arg0: i32, %arg1: i32, %arg2: i32) -> (i32, i32) {
    %c0_i32 = arith.constant 0 : i32
    %c0_i32_0 = arith.constant 0 : i32
    return %c0_i32, %arg1 : i32, i32
  }
  func.func @transform_3(%arg0: i32, %arg1: i32, %arg2: i32) -> (i32, i32) {
    %c0_i32 = arith.constant 0 : i32
    return %arg0, %arg1 : i32, i32
  }
}

module attributes {stable_mosaic.version = 11 : i64} {
  func.func @_linear_kernel(%arg0: i32, %arg1: i32, %arg2: i32, %arg3: memref<16x32xf32, #tpu.memory_space<vmem>>, %arg4: memref<32x96xf32, #tpu.memory_space<vmem>>, %arg5: memref<1x96xf32, #tpu.memory_space<vmem>>, %arg6: memref<16x96xf32, #tpu.memory_space<vmem>>, %arg7: memref<16x96xf32, #tpu.memory_space<vmem>>) attributes {dimension_semantics = [#tpu.dimension_semantics<parallel>, #tpu.dimension_semantics<parallel>, #tpu.dimension_semantics<arbitrary>], iteration_bounds = array<i64: 1, 1, 1>, scalar_prefetch = 0 : i64, scratch_operands = 1 : i64, tpu.core_type = #tpu.core_type<tc>, window_params = [{transform_indices = @transform_0, window_bounds = array<i64: 16, 32>}, {transform_indices = @transform_1, window_bounds = array<i64: 32, 96>}, {transform_indices = @transform_2, window_bounds = array<i64: 1, 96>}, {transform_indices = @transform_3, window_bounds = array<i64: 16, 96>}]} {
    %c0_i32 = arith.constant 0 : i32
    %0 = arith.cmpi eq, %arg2, %c0_i32 : i32
    %1 = arith.extui %0 : i1 to i32
    %c0_i32_0 = arith.constant 0 : i32
    %2 = arith.cmpi ne, %1, %c0_i32_0 : i32
    scf.if %2 {
      %cst_10 = arith.constant 0.000000e+00 : f32
      %14 = vector.broadcast %cst_10 : f32 to vector<16x96xf32>
      %c0_11 = arith.constant 0 : index
      %c0_12 = arith.constant 0 : index
      %15 = vector.load %arg7[%c0_11, %c0_12] : memref<16x96xf32, #tpu.memory_space<vmem>>, vector<16x96xf32>
      tpu.vector_store %arg7[%c0_11, %c0_12], %14 {strides = array<i32>} : memref<16x96xf32, #tpu.memory_space<vmem>>, vector<16x96xf32>,
    } else {
    }
    %c0 = arith.constant 0 : index
    %c0_1 = arith.constant 0 : index
    %3 = vector.load %arg7[%c0, %c0_1] : memref<16x96xf32, #tpu.memory_space<vmem>>, vector<16x96xf32>
    %c0_2 = arith.constant 0 : index
    %c0_3 = arith.constant 0 : index
    %4 = vector.load %arg3[%c0_2, %c0_3] : memref<16x32xf32, #tpu.memory_space<vmem>>, vector<16x32xf32>
    %5 = arith.truncf %4 : vector<16x32xf32> to vector<16x32xbf16>
    %c0_4 = arith.constant 0 : index
    %c0_5 = arith.constant 0 : index
    %6 = vector.load %arg4[%c0_4, %c0_5] : memref<32x96xf32, #tpu.memory_space<vmem>>, vector<32x96xf32>
    %7 = arith.truncf %6 : vector<32x96xf32> to vector<32x96xbf16>
    %cst = arith.constant dense<0.000000e+00> : vector<16x96xf32>
    %8 = tpu.matmul %5, %7, %cst {dimension_numbers = #tpu.dot_dimension_numbers<[1], [0], [0], [1], [0, 0, 1, 1], [], []>} : vector<16x32xbf16>, vector<32x96xbf16>, vector<16x96xf32> -> vector<16x96xf32>
    %9 = arith.addf %3, %8 : vector<16x96xf32>
    %c0_6 = arith.constant 0 : index
    %c0_7 = arith.constant 0 : index
    %10 = vector.load %arg7[%c0_6, %c0_7] : memref<16x96xf32, #tpu.memory_space<vmem>>, vector<16x96xf32>
    tpu.vector_store %arg7[%c0_6, %c0_7], %9 {strides = array<i32>} : memref<16x96xf32, #tpu.memory_space<vmem>>, vector<16x96xf32>,
    %c0_i32_8 = arith.constant 0 : i32
    %11 = arith.cmpi eq, %arg2, %c0_i32_8 : i32
    %12 = arith.extui %11 : i1 to i32
    %c0_i32_9 = arith.constant 0 : i32
    %13 = arith.cmpi ne, %12, %c0_i32_9 : i32
    scf.if %13 {
      %c0_10 = arith.constant 0 : index
      %c0_11 = arith.constant 0 : index
      %14 = vector.load %arg7[%c0_10, %c0_11] : memref<16x96xf32, #tpu.memory_space<vmem>>, vector<16x96xf32>
      %c0_12 = arith.constant 0 : index
      %c0_13 = arith.constant 0 : index
      %15 = vector.load %arg5[%c0_12, %c0_13] : memref<1x96xf32, #tpu.memory_space<vmem>>, vector<1x96xf32>
      %16 = vector.broadcast %15 : vector<1x96xf32> to vector<16x96xf32>
      %17 = arith.addf %14, %16 : vector<16x96xf32>
      %c0_14 = arith.constant 0 : index
      %c0_15 = arith.constant 0 : index
      %18 = vector.load %arg6[%c0_14, %c0_15] : memref<16x96xf32, #tpu.memory_space<vmem>>, vector<16x96xf32>
      tpu.vector_store %arg6[%c0_14, %c0_15], %17 {strides = array<i32>} : memref<16x96xf32, #tpu.memory_space<vmem>>, vector<16x96xf32>,
    } else {
    }
    return
  }
  func.func @transform_0(%arg0: i32, %arg1: i32, %arg2: i32) -> (i32, i32) {
    %c0_i32 = arith.constant 0 : i32
    return %arg0, %arg2 : i32, i32
  }
  func.func @transform_1(%arg0: i32, %arg1: i32, %arg2: i32) -> (i32, i32) {
    %c0_i32 = arith.constant 0 : i32
    return %arg2, %arg1 : i32, i32
  }
  func.func @transform_2(%arg0: i32, %arg1: i32, %arg2: i32) -> (i32, i32) {
    %c0_i32 = arith.constant 0 : i32
    %c0_i32_0 = arith.constant 0 : i32
    return %c0_i32, %arg1 : i32, i32
  }
  func.func @transform_3(%arg0: i32, %arg1: i32, %arg2: i32) -> (i32, i32) {
    %c0_i32 = arith.constant 0 : i32
    return %arg0, %arg1 : i32, i32
  }
}

module attributes {stable_mosaic.version = 11 : i64} {
  func.func @_attn_kernel(%arg0: i32, %arg1: memref<1x4x8x8xf32, #tpu.memory_space<vmem>>, %arg2: memref<1x4x8x8xf32, #tpu.memory_space<vmem>>, %arg3: memref<1x4x8x8xf32, #tpu.memory_space<vmem>>, %arg4: memref<1x1x8x8xf32, #tpu.memory_space<vmem>>, %arg5: memref<1x4x8x8xf32, #tpu.memory_space<vmem>>) attributes {dimension_semantics = [#tpu.dimension_semantics<parallel>], iteration_bounds = array<i64: 2>, scalar_prefetch = 0 : i64, scratch_operands = 0 : i64, tpu.core_type = #tpu.core_type<tc>, window_params = [{transform_indices = @transform_0, window_bounds = array<i64: 1, 4, 8, 8>}, {transform_indices = @transform_1, window_bounds = array<i64: 1, 4, 8, 8>}, {transform_indices = @transform_2, window_bounds = array<i64: 1, 4, 8, 8>}, {transform_indices = @transform_3, window_bounds = array<i64: 1, 1, 8, 8>}, {transform_indices = @transform_4, window_bounds = array<i64: 1, 4, 8, 8>}]} {
    %c0 = arith.constant 0 : index
    %c0_0 = arith.constant 0 : index
    %c0_1 = arith.constant 0 : index
    %c0_2 = arith.constant 0 : index
    %0 = vector.load %arg1[%c0, %c0_0, %c0_1, %c0_2] : memref<1x4x8x8xf32, #tpu.memory_space<vmem>>, vector<1x4x8x8xf32>
    %1 = vector.shape_cast %0 : vector<1x4x8x8xf32> to vector<4x8x8xf32>
    %cst = arith.constant 0.353553385 : f32
    %2 = vector.broadcast %cst : f32 to vector<4x8x8xf32>
    %3 = arith.mulf %1, %2 : vector<4x8x8xf32>
    %c0_3 = arith.constant 0 : index
    %c0_4 = arith.constant 0 : index
    %c0_5 = arith.constant 0 : index
    %c0_6 = arith.constant 0 : index
    %4 = vector.load %arg2[%c0_3, %c0_4, %c0_5, %c0_6] : memref<1x4x8x8xf32, #tpu.memory_space<vmem>>, vector<1x4x8x8xf32>
    %5 = vector.shape_cast %4 : vector<1x4x8x8xf32> to vector<4x8x8xf32>
    %c0_7 = arith.constant 0 : index
    %c0_8 = arith.constant 0 : index
    %c0_9 = arith.constant 0 : index
    %c0_10 = arith.constant 0 : index
    %6 = vector.load %arg3[%c0_7, %c0_8, %c0_9, %c0_10] : memref<1x4x8x8xf32, #tpu.memory_space<vmem>>, vector<1x4x8x8xf32>
    %7 = vector.shape_cast %6 : vector<1x4x8x8xf32> to vector<4x8x8xf32>
    %c0_11 = arith.constant 0 : index
    %c0_12 = arith.constant 0 : index
    %c0_13 = arith.constant 0 : index
    %c0_14 = arith.constant 0 : index
    %8 = vector.load %arg4[%c0_11, %c0_12, %c0_13, %c0_14] : memref<1x1x8x8xf32, #tpu.memory_space<vmem>>, vector<1x1x8x8xf32>
    %9 = vector.shape_cast %8 : vector<1x1x8x8xf32> to vector<8x8xf32>
    %10 = arith.truncf %3 : vector<4x8x8xf32> to vector<4x8x8xbf16>
    %11 = arith.truncf %5 : vector<4x8x8xf32> to vector<4x8x8xbf16>
    "tpu.trace_start"() <{level = 10 : i32, message = "hqd,hkd->hqk"}> : () -> ()
    %cst_15 = arith.constant dense<0.000000e+00> : vector<4x8x8xf32>
    %12 = tpu.matmul %10, %11, %cst_15 {dimension_numbers = #tpu.dot_dimension_numbers<[2], [2], [1], [1], [0, 0, 0, 1, 1, 1], [0], [0]>} : vector<4x8x8xbf16>, vector<4x8x8xbf16>, vector<4x8x8xf32> -> vector<4x8x8xf32>
    %cst_16 = arith.constant 0.000000e+00 : f32
    "tpu.trace_stop"() : () -> ()
    %13 = vector.broadcast %cst_16 : f32 to vector<8x8xf32>
    %14 = arith.cmpf oeq, %9, %13 : vector<8x8xf32>
    %cst_17 = arith.constant -1.000000e+10 : f32
    %15 = vector.shape_cast %14 : vector<8x8xi1> to vector<1x8x8xi1>
    %16 = vector.broadcast %15 : vector<1x8x8xi1> to vector<4x8x8xi1>
    %17 = vector.broadcast %cst_17 : f32 to vector<4x8x8xf32>
    %18 = arith.select %16, %17, %12 : vector<4x8x8xi1>, vector<4x8x8xf32>
    %cst_18 = arith.constant dense<0xFF800000> : vector<4x8xf32>
    %19 = vector.multi_reduction <maximumf>, %18, %cst_18 [2] : vector<4x8x8xf32> to vector<4x8xf32>
    %20 = vector.shape_cast %19 : vector<4x8xf32> to vector<4x8x1xf32>
    %21 = vector.broadcast %20 : vector<4x8x1xf32> to vector<4x8x8xf32>
    %22 = arith.subf %18, %21 : vector<4x8x8xf32>
    %23 = math.exp %22 : vector<4x8x8xf32>
    %cst_19 = arith.constant dense<0.000000e+00> : vector<4x8xf32>
    %24 = vector.multi_reduction <add>, %23, %cst_19 [2] : vector<4x8x8xf32> to vector<4x8xf32>
    %25 = vector.shape_cast %24 : vector<4x8xf32> to vector<4x8x1xf32>
    %26 = tpu.reciprocal %25 : vector<4x8x1xf32> -> vector<4x8x1xf32>
    %27 = vector.broadcast %26 : vector<4x8x1xf32> to vector<4x8x8xf32>
    %28 = arith.mulf %23, %27 : vector<4x8x8xf32>
    %29 = arith.truncf %28 : vector<4x8x8xf32> to vector<4x8x8xbf16>
    %30 = arith.truncf %7 : vector<4x8x8xf32> to vector<4x8x8xbf16>
    "tpu.trace_start"() <{level = 10 : i32, message = "hqk,hkd->hqd"}> : () -> ()
    %cst_20 = arith.constant dense<0.000000e+00> : vector<4x8x8xf32>
    %31 = tpu.matmul %29, %30, %cst_20 {dimension_numbers = #tpu.dot_dimension_numbers<[2], [1], [1], [2], [0, 0, 0, 1, 1, 2], [0], [0]>} : vector<4x8x8xbf16>, vector<4x8x8xbf16>, vector<4x8x8xf32> -> vector<4x8x8xf32>
    "tpu.trace_stop"() : () -> ()
    %32 = vector.shape_cast %31 : vector<4x8x8xf32> to vector<1x4x8x8xf32>
    %c0_21 = arith.constant 0 : index
    %c0_22 = arith.constant 0 : index
    %c0_23 = arith.constant 0 : index
    %c0_24 = arith.constant 0 : index
    %33 = vector.load %arg5[%c0_21, %c0_22, %c0_23, %c0_24] : memref<1x4x8x8xf32, #tpu.memory_space<vmem>>, vector<1x4x8x8xf32>
    tpu.vector_store %arg5[%c0_21, %c0_22, %c0_23, %c0_24], %32 {strides = array<i32>} : memref<1x4x8x8xf32, #tpu.memory_space<vmem>>, vector<1x4x8x8xf32>,
    return
  }
  func.func @transform_0(%arg0: i32) -> (i32, i32, i32, i32) {
    %c0_i32 = arith.constant 0 : i32
    %c0_i32_0 = arith.constant 0 : i32
    %c0_i32_1 = arith.constant 0 : i32
    %c0_i32_2 = arith.constant 0 : i32
    return %arg0, %c0_i32, %c0_i32_0, %c0_i32_1 : i32, i32, i32, i32
  }
  func.func @transform_1(%arg0: i32) -> (i32, i32, i32, i32) {
    %c0_i32 = arith.constant 0 : i32
    %c0_i32_0 = arith.constant 0 : i32
    %c0_i32_1 = arith.constant 0 : i32
    %c0_i32_2 = arith.constant 0 : i32
    return %arg0, %c0_i32, %c0_i32_0, %c0_i32_1 : i32, i32, i32, i32
  }
  func.func @transform_2(%arg0: i32) -> (i32, i32, i32, i32) {
    %c0_i32 = arith.constant 0 : i32
    %c0_i32_0 = arith.constant 0 : i32
    %c0_i32_1 = arith.constant 0 : i32
    %c0_i32_2 = arith.constant 0 : i32
    return %arg0, %c0_i32, %c0_i32_0, %c0_i32_1 : i32, i32, i32, i32
  }
  func.func @transform_3(%arg0: i32) -> (i32, i32, i32, i32) {
    %c0_i32 = arith.constant 0 : i32
    %c0_i32_0 = arith.constant 0 : i32
    %c0_i32_1 = arith.constant 0 : i32
    %c0_i32_2 = arith.constant 0 : i32
    return %arg0, %c0_i32, %c0_i32_0, %c0_i32_1 : i32, i32, i32, i32
  }
  func.func @transform_4(%arg0: i32) -> (i32, i32, i32, i32) {
    %c0_i32 = arith.constant 0 : i32
    %c0_i32_0 = arith.constant 0 : i32
    %c0_i32_1 = arith.constant 0 : i32
    %c0_i32_2 = arith.constant 0 : i32
    return %arg0, %c0_i32, %c0_i32_0, %c0_i32_1 : i32, i32, i32, i32
  }
}

module attributes {stable_mosaic.version = 11 : i64} {
  func.func @_proj_add_ln_kernel(%arg0: i32, %arg1: memref<16x32xf32, #tpu.memory_space<vmem>>, %arg2: memref<32x32xf32, #tpu.memory_space<vmem>>, %arg3: memref<1x32xf32, #tpu.memory_space<vmem>>, %arg4: memref<16x32xf32, #tpu.memory_space<vmem>>, %arg5: memref<1x32xf32, #tpu.memory_space<vmem>>, %arg6: memref<1x32xf32, #tpu.memory_space<vmem>>, %arg7: memref<16x32xf32, #tpu.memory_space<vmem>>) attributes {dimension_semantics = [#tpu.dimension_semantics<parallel>], iteration_bounds = array<i64: 1>, scalar_prefetch = 0 : i64, scratch_operands = 0 : i64, tpu.core_type = #tpu.core_type<tc>, window_params = [{transform_indices = @transform_0, window_bounds = array<i64: 16, 32>}, {pipeline_mode = #tpu.pipeline_mode<synchronous>, transform_indices = @transform_1, window_bounds = array<i64: 32, 32>}, {pipeline_mode = #tpu.pipeline_mode<synchronous>, transform_indices = @transform_2, window_bounds = array<i64: 1, 32>}, {transform_indices = @transform_3, window_bounds = array<i64: 16, 32>}, {pipeline_mode = #tpu.pipeline_mode<synchronous>, transform_indices = @transform_4, window_bounds = array<i64: 1, 32>}, {pipeline_mode = #tpu.pipeline_mode<synchronous>, transform_indices = @transform_5, window_bounds = array<i64: 1, 32>}, {transform_indices = @transform_6, window_bounds = array<i64: 16, 32>}]} {
    %c0 = arith.constant 0 : index
    %c0_0 = arith.constant 0 : index
    %0 = vector.load %arg1[%c0, %c0_0] : memref<16x32xf32, #tpu.memory_space<vmem>>, vector<16x32xf32>
    %1 = arith.truncf %0 : vector<16x32xf32> to vector<16x32xbf16>
    %c0_1 = arith.constant 0 : index
    %c0_2 = arith.constant 0 : index
    %2 = vector.load %arg2[%c0_1, %c0_2] : memref<32x32xf32, #tpu.memory_space<vmem>>, vector<32x32xf32>
    %3 = arith.truncf %2 : vector<32x32xf32> to vector<32x32xbf16>
    %cst = arith.constant dense<0.000000e+00> : vector<16x32xf32>
    %4 = tpu.matmul %1, %3, %cst {dimension_numbers = #tpu.dot_dimension_numbers<[1], [0], [0], [1], [0, 0, 1, 1], [], []>} : vector<16x32xbf16>, vector<32x32xbf16>, vector<16x32xf32> -> vector<16x32xf32>
    %c0_3 = arith.constant 0 : index
    %c0_4 = arith.constant 0 : index
    %5 = vector.load %arg3[%c0_3, %c0_4] : memref<1x32xf32, #tpu.memory_space<vmem>>, vector<1x32xf32>
    %6 = vector.broadcast %5 : vector<1x32xf32> to vector<16x32xf32>
    %7 = arith.addf %4, %6 : vector<16x32xf32>
    %c0_5 = arith.constant 0 : index
    %c0_6 = arith.constant 0 : index
    %8 = vector.load %arg4[%c0_5, %c0_6] : memref<16x32xf32, #tpu.memory_space<vmem>>, vector<16x32xf32>
    %9 = arith.addf %8, %7 : vector<16x32xf32>
    %cst_7 = arith.constant dense<0.000000e+00> : vector<16xf32>
    %10 = vector.multi_reduction <add>, %9, %cst_7 [1] : vector<16x32xf32> to vector<16xf32>
    %11 = vector.shape_cast %10 : vector<16xf32> to vector<16x1xf32>
    %cst_8 = arith.constant 3.200000e+01 : f32
    %12 = vector.broadcast %cst_8 : f32 to vector<16x1xf32>
    %13 = arith.divf %11, %12 : vector<16x1xf32>
    %14 = vector.broadcast %13 : vector<16x1xf32> to vector<16x32xf32>
    %15 = arith.subf %9, %14 : vector<16x32xf32>
    %16 = vector.broadcast %13 : vector<16x1xf32> to vector<16x32xf32>
    %17 = arith.subf %9, %16 : vector<16x32xf32>
    %18 = arith.mulf %15, %17 : vector<16x32xf32>
    %cst_9 = arith.constant dense<0.000000e+00> : vector<16xf32>
    %19 = vector.multi_reduction <add>, %18, %cst_9 [1] : vector<16x32xf32> to vector<16xf32>
    %20 = vector.shape_cast %19 : vector<16xf32> to vector<16x1xf32>
    %cst_10 = arith.constant 3.200000e+01 : f32
    %21 = vector.broadcast %cst_10 : f32 to vector<16x1xf32>
    %22 = arith.divf %20, %21 : vector<16x1xf32>
    %23 = vector.broadcast %13 : vector<16x1xf32> to vector<16x32xf32>
    %24 = arith.subf %9, %23 : vector<16x32xf32>
    %cst_11 = arith.constant 9.99999974E-6 : f32
    %25 = vector.broadcast %cst_11 : f32 to vector<16x1xf32>
    %26 = arith.addf %22, %25 : vector<16x1xf32>
    %27 = math.rsqrt %26 : vector<16x1xf32>
    %28 = vector.broadcast %27 : vector<16x1xf32> to vector<16x32xf32>
    %29 = arith.mulf %24, %28 : vector<16x32xf32>
    %c0_12 = arith.constant 0 : index
    %c0_13 = arith.constant 0 : index
    %30 = vector.load %arg5[%c0_12, %c0_13] : memref<1x32xf32, #tpu.memory_space<vmem>>, vector<1x32xf32>
    %31 = vector.broadcast %30 : vector<1x32xf32> to vector<16x32xf32>
    %32 = arith.mulf %29, %31 : vector<16x32xf32>
    %c0_14 = arith.constant 0 : index
    %c0_15 = arith.constant 0 : index
    %33 = vector.load %arg6[%c0_14, %c0_15] : memref<1x32xf32, #tpu.memory_space<vmem>>, vector<1x32xf32>
    %34 = vector.broadcast %33 : vector<1x32xf32> to vector<16x32xf32>
    %35 = arith.addf %32, %34 : vector<16x32xf32>
    %c0_16 = arith.constant 0 : index
    %c0_17 = arith.constant 0 : index
    %36 = vector.load %arg7[%c0_16, %c0_17] : memref<16x32xf32, #tpu.memory_space<vmem>>, vector<16x32xf32>
    tpu.vector_store %arg7[%c0_16, %c0_17], %35 {strides = array<i32>} : memref<16x32xf32, #tpu.memory_space<vmem>>, vector<16x32xf32>,
    return
  }
  func.func @transform_0(%arg0: i32) -> (i32, i32) {
    %c0_i32 = arith.constant 0 : i32
    %c0_i32_0 = arith.constant 0 : i32
    return %arg0, %c0_i32 : i32, i32
  }
  func.func @transform_1(%arg0: i32) -> (i32, i32) {
    %c0_i32 = arith.constant 0 : i32
    %c0_i32_0 = arith.constant 0 : i32
    %c0_i32_1 = arith.constant 0 : i32
    return %c0_i32, %c0_i32_0 : i32, i32
  }
  func.func @transform_2(%arg0: i32) -> (i32, i32) {
    %c0_i32 = arith.constant 0 : i32
    %c0_i32_0 = arith.constant 0 : i32
    %c0_i32_1 = arith.constant 0 : i32
    return %c0_i32, %c0_i32_0 : i32, i32
  }
  func.func @transform_3(%arg0: i32) -> (i32, i32) {
    %c0_i32 = arith.constant 0 : i32
    %c0_i32_0 = arith.constant 0 : i32
    return %arg0, %c0_i32 : i32, i32
  }
  func.func @transform_4(%arg0: i32) -> (i32, i32) {
    %c0_i32 = arith.constant 0 : i32
    %c0_i32_0 = arith.constant 0 : i32
    %c0_i32_1 = arith.constant 0 : i32
    return %c0_i32, %c0_i32_0 : i32, i32
  }
  func.func @transform_5(%arg0: i32) -> (i32, i32) {
    %c0_i32 = arith.constant 0 : i32
    %c0_i32_0 = arith.constant 0 : i32
    %c0_i32_1 = arith.constant 0 : i32
    return %c0_i32, %c0_i32_0 : i32, i32
  }
  func.func @transform_6(%arg0: i32) -> (i32, i32) {
    %c0_i32 = arith.constant 0 : i32
    %c0_i32_0 = arith.constant 0 : i32
    return %arg0, %c0_i32 : i32, i32
  }
}

module attributes {stable_mosaic.version = 11 : i64} {
  func.func @_linear_kernel(%arg0: i32, %arg1: i32, %arg2: i32, %arg3: memref<20x32xf32, #tpu.memory_space<vmem>>, %arg4: memref<32x64xf32, #tpu.memory_space<vmem>>, %arg5: memref<1x64xf32, #tpu.memory_space<vmem>>, %arg6: memref<20x64xf32, #tpu.memory_space<vmem>>, %arg7: memref<20x64xf32, #tpu.memory_space<vmem>>) attributes {dimension_semantics = [#tpu.dimension_semantics<parallel>, #tpu.dimension_semantics<parallel>, #tpu.dimension_semantics<arbitrary>], iteration_bounds = array<i64: 1, 1, 1>, scalar_prefetch = 0 : i64, scratch_operands = 1 : i64, tpu.core_type = #tpu.core_type<tc>, window_params = [{transform_indices = @transform_0, window_bounds = array<i64: 20, 32>}, {transform_indices = @transform_1, window_bounds = array<i64: 32, 64>}, {transform_indices = @transform_2, window_bounds = array<i64: 1, 64>}, {transform_indices = @transform_3, window_bounds = array<i64: 20, 64>}]} {
    %c0_i32 = arith.constant 0 : i32
    %0 = arith.cmpi eq, %arg2, %c0_i32 : i32
    %1 = arith.extui %0 : i1 to i32
    %c0_i32_0 = arith.constant 0 : i32
    %2 = arith.cmpi ne, %1, %c0_i32_0 : i32
    scf.if %2 {
      %cst_10 = arith.constant 0.000000e+00 : f32
      %14 = vector.broadcast %cst_10 : f32 to vector<20x64xf32>
      %c0_11 = arith.constant 0 : index
      %c0_12 = arith.constant 0 : index
      %15 = vector.load %arg7[%c0_11, %c0_12] : memref<20x64xf32, #tpu.memory_space<vmem>>, vector<20x64xf32>
      tpu.vector_store %arg7[%c0_11, %c0_12], %14 {strides = array<i32>} : memref<20x64xf32, #tpu.memory_space<vmem>>, vector<20x64xf32>,
    } else {
    }
    %c0 = arith.constant 0 : index
    %c0_1 = arith.constant 0 : index
    %3 = vector.load %arg7[%c0, %c0_1] : memref<20x64xf32, #tpu.memory_space<vmem>>, vector<20x64xf32>
    %c0_2 = arith.constant 0 : index
    %c0_3 = arith.constant 0 : index
    %4 = vector.load %arg3[%c0_2, %c0_3] : memref<20x32xf32, #tpu.memory_space<vmem>>, vector<20x32xf32>
    %5 = arith.truncf %4 : vector<20x32xf32> to vector<20x32xbf16>
    %c0_4 = arith.constant 0 : index
    %c0_5 = arith.constant 0 : index
    %6 = vector.load %arg4[%c0_4, %c0_5] : memref<32x64xf32, #tpu.memory_space<vmem>>, vector<32x64xf32>
    %7 = arith.truncf %6 : vector<32x64xf32> to vector<32x64xbf16>
    %cst = arith.constant dense<0.000000e+00> : vector<20x64xf32>
    %8 = tpu.matmul %5, %7, %cst {dimension_numbers = #tpu.dot_dimension_numbers<[1], [0], [0], [1], [0, 0, 1, 1], [], []>} : vector<20x32xbf16>, vector<32x64xbf16>, vector<20x64xf32> -> vector<20x64xf32>
    %9 = arith.addf %3, %8 : vector<20x64xf32>
    %c0_6 = arith.constant 0 : index
    %c0_7 = arith.constant 0 : index
    %10 = vector.load %arg7[%c0_6, %c0_7] : memref<20x64xf32, #tpu.memory_space<vmem>>, vector<20x64xf32>
    tpu.vector_store %arg7[%c0_6, %c0_7], %9 {strides = array<i32>} : memref<20x64xf32, #tpu.memory_space<vmem>>, vector<20x64xf32>,
    %c0_i32_8 = arith.constant 0 : i32
    %11 = arith.cmpi eq, %arg2, %c0_i32_8 : i32
    %12 = arith.extui %11 : i1 to i32
    %c0_i32_9 = arith.constant 0 : i32
    %13 = arith.cmpi ne, %12, %c0_i32_9 : i32
    scf.if %13 {
      %c0_10 = arith.constant 0 : index
      %c0_11 = arith.constant 0 : index
      %14 = vector.load %arg7[%c0_10, %c0_11] : memref<20x64xf32, #tpu.memory_space<vmem>>, vector<20x64xf32>
      %c0_12 = arith.constant 0 : index
      %c0_13 = arith.constant 0 : index
      %15 = vector.load %arg5[%c0_12, %c0_13] : memref<1x64xf32, #tpu.memory_space<vmem>>, vector<1x64xf32>
      %16 = vector.broadcast %15 : vector<1x64xf32> to vector<20x64xf32>
      %17 = arith.addf %14, %16 : vector<20x64xf32>
      %c0_14 = arith.constant 0 : index
      %c0_15 = arith.constant 0 : index
      %18 = vector.load %arg6[%c0_14, %c0_15] : memref<20x64xf32, #tpu.memory_space<vmem>>, vector<20x64xf32>
      tpu.vector_store %arg6[%c0_14, %c0_15], %17 {strides = array<i32>} : memref<20x64xf32, #tpu.memory_space<vmem>>, vector<20x64xf32>,
    } else {
    }
    return
  }
  func.func @transform_0(%arg0: i32, %arg1: i32, %arg2: i32) -> (i32, i32) {
    %c0_i32 = arith.constant 0 : i32
    return %arg0, %arg2 : i32, i32
  }
  func.func @transform_1(%arg0: i32, %arg1: i32, %arg2: i32) -> (i32, i32) {
    %c0_i32 = arith.constant 0 : i32
    return %arg2, %arg1 : i32, i32
  }
  func.func @transform_2(%arg0: i32, %arg1: i32, %arg2: i32) -> (i32, i32) {
    %c0_i32 = arith.constant 0 : i32
    %c0_i32_0 = arith.constant 0 : i32
    return %c0_i32, %arg1 : i32, i32
  }
  func.func @transform_3(%arg0: i32, %arg1: i32, %arg2: i32) -> (i32, i32) {
    %c0_i32 = arith.constant 0 : i32
    return %arg0, %arg1 : i32, i32
  }
}

module attributes {stable_mosaic.version = 11 : i64} {
  func.func @_attn_kernel(%arg0: i32, %arg1: memref<1x4x8x8xf32, #tpu.memory_space<vmem>>, %arg2: memref<1x4x10x8xf32, #tpu.memory_space<vmem>>, %arg3: memref<1x4x10x8xf32, #tpu.memory_space<vmem>>, %arg4: memref<1x1x8x10xf32, #tpu.memory_space<vmem>>, %arg5: memref<1x4x8x8xf32, #tpu.memory_space<vmem>>) attributes {dimension_semantics = [#tpu.dimension_semantics<parallel>], iteration_bounds = array<i64: 2>, scalar_prefetch = 0 : i64, scratch_operands = 0 : i64, tpu.core_type = #tpu.core_type<tc>, window_params = [{transform_indices = @transform_0, window_bounds = array<i64: 1, 4, 8, 8>}, {transform_indices = @transform_1, window_bounds = array<i64: 1, 4, 10, 8>}, {transform_indices = @transform_2, window_bounds = array<i64: 1, 4, 10, 8>}, {transform_indices = @transform_3, window_bounds = array<i64: 1, 1, 8, 10>}, {transform_indices = @transform_4, window_bounds = array<i64: 1, 4, 8, 8>}]} {
    %c0 = arith.constant 0 : index
    %c0_0 = arith.constant 0 : index
    %c0_1 = arith.constant 0 : index
    %c0_2 = arith.constant 0 : index
    %0 = vector.load %arg1[%c0, %c0_0, %c0_1, %c0_2] : memref<1x4x8x8xf32, #tpu.memory_space<vmem>>, vector<1x4x8x8xf32>
    %1 = vector.shape_cast %0 : vector<1x4x8x8xf32> to vector<4x8x8xf32>
    %cst = arith.constant 0.353553385 : f32
    %2 = vector.broadcast %cst : f32 to vector<4x8x8xf32>
    %3 = arith.mulf %1, %2 : vector<4x8x8xf32>
    %c0_3 = arith.constant 0 : index
    %c0_4 = arith.constant 0 : index
    %c0_5 = arith.constant 0 : index
    %c0_6 = arith.constant 0 : index
    %4 = vector.load %arg2[%c0_3, %c0_4, %c0_5, %c0_6] : memref<1x4x10x8xf32, #tpu.memory_space<vmem>>, vector<1x4x10x8xf32>
    %5 = vector.shape_cast %4 : vector<1x4x10x8xf32> to vector<4x10x8xf32>
    %c0_7 = arith.constant 0 : index
    %c0_8 = arith.constant 0 : index
    %c0_9 = arith.constant 0 : index
    %c0_10 = arith.constant 0 : index
    %6 = vector.load %arg3[%c0_7, %c0_8, %c0_9, %c0_10] : memref<1x4x10x8xf32, #tpu.memory_space<vmem>>, vector<1x4x10x8xf32>
    %7 = vector.shape_cast %6 : vector<1x4x10x8xf32> to vector<4x10x8xf32>
    %c0_11 = arith.constant 0 : index
    %c0_12 = arith.constant 0 : index
    %c0_13 = arith.constant 0 : index
    %c0_14 = arith.constant 0 : index
    %8 = vector.load %arg4[%c0_11, %c0_12, %c0_13, %c0_14] : memref<1x1x8x10xf32, #tpu.memory_space<vmem>>, vector<1x1x8x10xf32>
    %9 = vector.shape_cast %8 : vector<1x1x8x10xf32> to vector<8x10xf32>
    %10 = arith.truncf %3 : vector<4x8x8xf32> to vector<4x8x8xbf16>
    %11 = arith.truncf %5 : vector<4x10x8xf32> to vector<4x10x8xbf16>
    "tpu.trace_start"() <{level = 10 : i32, message = "hqd,hkd->hqk"}> : () -> ()
    %cst_15 = arith.constant dense<0.000000e+00> : vector<4x8x10xf32>
    %12 = tpu.matmul %10, %11, %cst_15 {dimension_numbers = #tpu.dot_dimension_numbers<[2], [2], [1], [1], [0, 0, 0, 1, 1, 1], [0], [0]>} : vector<4x8x8xbf16>, vector<4x10x8xbf16>, vector<4x8x10xf32> -> vector<4x8x10xf32>
    %cst_16 = arith.constant 0.000000e+00 : f32
    "tpu.trace_stop"() : () -> ()
    %13 = vector.broadcast %cst_16 : f32 to vector<8x10xf32>
    %14 = arith.cmpf oeq, %9, %13 : vector<8x10xf32>
    %cst_17 = arith.constant -1.000000e+10 : f32
    %15 = vector.shape_cast %14 : vector<8x10xi1> to vector<1x8x10xi1>
    %16 = vector.broadcast %15 : vector<1x8x10xi1> to vector<4x8x10xi1>
    %17 = vector.broadcast %cst_17 : f32 to vector<4x8x10xf32>
    %18 = arith.select %16, %17, %12 : vector<4x8x10xi1>, vector<4x8x10xf32>
    %cst_18 = arith.constant dense<0xFF800000> : vector<4x8xf32>
    %19 = vector.multi_reduction <maximumf>, %18, %cst_18 [2] : vector<4x8x10xf32> to vector<4x8xf32>
    %20 = vector.shape_cast %19 : vector<4x8xf32> to vector<4x8x1xf32>
    %21 = vector.broadcast %20 : vector<4x8x1xf32> to vector<4x8x10xf32>
    %22 = arith.subf %18, %21 : vector<4x8x10xf32>
    %23 = math.exp %22 : vector<4x8x10xf32>
    %cst_19 = arith.constant dense<0.000000e+00> : vector<4x8xf32>
    %24 = vector.multi_reduction <add>, %23, %cst_19 [2] : vector<4x8x10xf32> to vector<4x8xf32>
    %25 = vector.shape_cast %24 : vector<4x8xf32> to vector<4x8x1xf32>
    %26 = tpu.reciprocal %25 : vector<4x8x1xf32> -> vector<4x8x1xf32>
    %27 = vector.broadcast %26 : vector<4x8x1xf32> to vector<4x8x10xf32>
    %28 = arith.mulf %23, %27 : vector<4x8x10xf32>
    %29 = arith.truncf %28 : vector<4x8x10xf32> to vector<4x8x10xbf16>
    %30 = arith.truncf %7 : vector<4x10x8xf32> to vector<4x10x8xbf16>
    "tpu.trace_start"() <{level = 10 : i32, message = "hqk,hkd->hqd"}> : () -> ()
    %cst_20 = arith.constant dense<0.000000e+00> : vector<4x8x8xf32>
    %31 = tpu.matmul %29, %30, %cst_20 {dimension_numbers = #tpu.dot_dimension_numbers<[2], [1], [1], [2], [0, 0, 0, 1, 1, 2], [0], [0]>} : vector<4x8x10xbf16>, vector<4x10x8xbf16>, vector<4x8x8xf32> -> vector<4x8x8xf32>
    "tpu.trace_stop"() : () -> ()
    %32 = vector.shape_cast %31 : vector<4x8x8xf32> to vector<1x4x8x8xf32>
    %c0_21 = arith.constant 0 : index
    %c0_22 = arith.constant 0 : index
    %c0_23 = arith.constant 0 : index
    %c0_24 = arith.constant 0 : index
    %33 = vector.load %arg5[%c0_21, %c0_22, %c0_23, %c0_24] : memref<1x4x8x8xf32, #tpu.memory_space<vmem>>, vector<1x4x8x8xf32>
    tpu.vector_store %arg5[%c0_21, %c0_22, %c0_23, %c0_24], %32 {strides = array<i32>} : memref<1x4x8x8xf32, #tpu.memory_space<vmem>>, vector<1x4x8x8xf32>,
    return
  }
  func.func @transform_0(%arg0: i32) -> (i32, i32, i32, i32) {
    %c0_i32 = arith.constant 0 : i32
    %c0_i32_0 = arith.constant 0 : i32
    %c0_i32_1 = arith.constant 0 : i32
    %c0_i32_2 = arith.constant 0 : i32
    return %arg0, %c0_i32, %c0_i32_0, %c0_i32_1 : i32, i32, i32, i32
  }
  func.func @transform_1(%arg0: i32) -> (i32, i32, i32, i32) {
    %c0_i32 = arith.constant 0 : i32
    %c0_i32_0 = arith.constant 0 : i32
    %c0_i32_1 = arith.constant 0 : i32
    %c0_i32_2 = arith.constant 0 : i32
    return %arg0, %c0_i32, %c0_i32_0, %c0_i32_1 : i32, i32, i32, i32
  }
  func.func @transform_2(%arg0: i32) -> (i32, i32, i32, i32) {
    %c0_i32 = arith.constant 0 : i32
    %c0_i32_0 = arith.constant 0 : i32
    %c0_i32_1 = arith.constant 0 : i32
    %c0_i32_2 = arith.constant 0 : i32
    return %arg0, %c0_i32, %c0_i32_0, %c0_i32_1 : i32, i32, i32, i32
  }
  func.func @transform_3(%arg0: i32) -> (i32, i32, i32, i32) {
    %c0_i32 = arith.constant 0 : i32
    %c0_i32_0 = arith.constant 0 : i32
    %c0_i32_1 = arith.constant 0 : i32
    %c0_i32_2 = arith.constant 0 : i32
    return %arg0, %c0_i32, %c0_i32_0, %c0_i32_1 : i32, i32, i32, i32
  }
  func.func @transform_4(%arg0: i32) -> (i32, i32, i32, i32) {
    %c0_i32 = arith.constant 0 : i32
    %c0_i32_0 = arith.constant 0 : i32
    %c0_i32_1 = arith.constant 0 : i32
    %c0_i32_2 = arith.constant 0 : i32
    return %arg0, %c0_i32, %c0_i32_0, %c0_i32_1 : i32, i32, i32, i32
  }
}

module attributes {stable_mosaic.version = 11 : i64} {
  func.func @_attn_kernel(%arg0: i32, %arg1: memref<1x4x8x8xf32, #tpu.memory_space<vmem>>, %arg2: memref<1x4x10x8xf32, #tpu.memory_space<vmem>>, %arg3: memref<1x4x10x8xf32, #tpu.memory_space<vmem>>, %arg4: memref<1x1x8x10xf32, #tpu.memory_space<vmem>>, %arg5: memref<1x4x8x8xf32, #tpu.memory_space<vmem>>, %arg6: memref<1x4x8x10xf32, #tpu.memory_space<vmem>>) attributes {dimension_semantics = [#tpu.dimension_semantics<parallel>], iteration_bounds = array<i64: 2>, scalar_prefetch = 0 : i64, scratch_operands = 0 : i64, tpu.core_type = #tpu.core_type<tc>, window_params = [{transform_indices = @transform_0, window_bounds = array<i64: 1, 4, 8, 8>}, {transform_indices = @transform_1, window_bounds = array<i64: 1, 4, 10, 8>}, {transform_indices = @transform_2, window_bounds = array<i64: 1, 4, 10, 8>}, {transform_indices = @transform_3, window_bounds = array<i64: 1, 1, 8, 10>}, {transform_indices = @transform_4, window_bounds = array<i64: 1, 4, 8, 8>}, {transform_indices = @transform_5, window_bounds = array<i64: 1, 4, 8, 10>}]} {
    %c0 = arith.constant 0 : index
    %c0_0 = arith.constant 0 : index
    %c0_1 = arith.constant 0 : index
    %c0_2 = arith.constant 0 : index
    %0 = vector.load %arg1[%c0, %c0_0, %c0_1, %c0_2] : memref<1x4x8x8xf32, #tpu.memory_space<vmem>>, vector<1x4x8x8xf32>
    %1 = vector.shape_cast %0 : vector<1x4x8x8xf32> to vector<4x8x8xf32>
    %cst = arith.constant 0.353553385 : f32
    %2 = vector.broadcast %cst : f32 to vector<4x8x8xf32>
    %3 = arith.mulf %1, %2 : vector<4x8x8xf32>
    %c0_3 = arith.constant 0 : index
    %c0_4 = arith.constant 0 : index
    %c0_5 = arith.constant 0 : index
    %c0_6 = arith.constant 0 : index
    %4 = vector.load %arg2[%c0_3, %c0_4, %c0_5, %c0_6] : memref<1x4x10x8xf32, #tpu.memory_space<vmem>>, vector<1x4x10x8xf32>
    %5 = vector.shape_cast %4 : vector<1x4x10x8xf32> to vector<4x10x8xf32>
    %c0_7 = arith.constant 0 : index
    %c0_8 = arith.constant 0 : index
    %c0_9 = arith.constant 0 : index
    %c0_10 = arith.constant 0 : index
    %6 = vector.load %arg3[%c0_7, %c0_8, %c0_9, %c0_10] : memref<1x4x10x8xf32, #tpu.memory_space<vmem>>, vector<1x4x10x8xf32>
    %7 = vector.shape_cast %6 : vector<1x4x10x8xf32> to vector<4x10x8xf32>
    %c0_11 = arith.constant 0 : index
    %c0_12 = arith.constant 0 : index
    %c0_13 = arith.constant 0 : index
    %c0_14 = arith.constant 0 : index
    %8 = vector.load %arg4[%c0_11, %c0_12, %c0_13, %c0_14] : memref<1x1x8x10xf32, #tpu.memory_space<vmem>>, vector<1x1x8x10xf32>
    %9 = vector.shape_cast %8 : vector<1x1x8x10xf32> to vector<8x10xf32>
    %10 = arith.truncf %3 : vector<4x8x8xf32> to vector<4x8x8xbf16>
    %11 = arith.truncf %5 : vector<4x10x8xf32> to vector<4x10x8xbf16>
    "tpu.trace_start"() <{level = 10 : i32, message = "hqd,hkd->hqk"}> : () -> ()
    %cst_15 = arith.constant dense<0.000000e+00> : vector<4x8x10xf32>
    %12 = tpu.matmul %10, %11, %cst_15 {dimension_numbers = #tpu.dot_dimension_numbers<[2], [2], [1], [1], [0, 0, 0, 1, 1, 1], [0], [0]>} : vector<4x8x8xbf16>, vector<4x10x8xbf16>, vector<4x8x10xf32> -> vector<4x8x10xf32>
    %cst_16 = arith.constant 0.000000e+00 : f32
    "tpu.trace_stop"() : () -> ()
    %13 = vector.broadcast %cst_16 : f32 to vector<8x10xf32>
    %14 = arith.cmpf oeq, %9, %13 : vector<8x10xf32>
    %cst_17 = arith.constant -1.000000e+10 : f32
    %15 = vector.shape_cast %14 : vector<8x10xi1> to vector<1x8x10xi1>
    %16 = vector.broadcast %15 : vector<1x8x10xi1> to vector<4x8x10xi1>
    %17 = vector.broadcast %cst_17 : f32 to vector<4x8x10xf32>
    %18 = arith.select %16, %17, %12 : vector<4x8x10xi1>, vector<4x8x10xf32>
    %cst_18 = arith.constant dense<0xFF800000> : vector<4x8xf32>
    %19 = vector.multi_reduction <maximumf>, %18, %cst_18 [2] : vector<4x8x10xf32> to vector<4x8xf32>
    %20 = vector.shape_cast %19 : vector<4x8xf32> to vector<4x8x1xf32>
    %21 = vector.broadcast %20 : vector<4x8x1xf32> to vector<4x8x10xf32>
    %22 = arith.subf %18, %21 : vector<4x8x10xf32>
    %23 = math.exp %22 : vector<4x8x10xf32>
    %cst_19 = arith.constant dense<0.000000e+00> : vector<4x8xf32>
    %24 = vector.multi_reduction <add>, %23, %cst_19 [2] : vector<4x8x10xf32> to vector<4x8xf32>
    %25 = vector.shape_cast %24 : vector<4x8xf32> to vector<4x8x1xf32>
    %26 = tpu.reciprocal %25 : vector<4x8x1xf32> -> vector<4x8x1xf32>
    %27 = vector.broadcast %26 : vector<4x8x1xf32> to vector<4x8x10xf32>
    %28 = arith.mulf %23, %27 : vector<4x8x10xf32>
    %29 = vector.shape_cast %28 : vector<4x8x10xf32> to vector<1x4x8x10xf32>
    %c0_20 = arith.constant 0 : index
    %c0_21 = arith.constant 0 : index
    %c0_22 = arith.constant 0 : index
    %c0_23 = arith.constant 0 : index
    %30 = vector.load %arg6[%c0_20, %c0_21, %c0_22, %c0_23] : memref<1x4x8x10xf32, #tpu.memory_space<vmem>>, vector<1x4x8x10xf32>
    tpu.vector_store %arg6[%c0_20, %c0_21, %c0_22, %c0_23], %29 {strides = array<i32>} : memref<1x4x8x10xf32, #tpu.memory_space<vmem>>, vector<1x4x8x10xf32>,
    %31 = arith.truncf %28 : vector<4x8x10xf32> to vector<4x8x10xbf16>
    %32 = arith.truncf %7 : vector<4x10x8xf32> to vector<4x10x8xbf16>
    "tpu.trace_start"() <{level = 10 : i32, message = "hqk,hkd->hqd"}> : () -> ()
    %cst_24 = arith.constant dense<0.000000e+00> : vector<4x8x8xf32>
    %33 = tpu.matmul %31, %32, %cst_24 {dimension_numbers = #tpu.dot_dimension_numbers<[2], [1], [1], [2], [0, 0, 0, 1, 1, 2], [0], [0]>} : vector<4x8x10xbf16>, vector<4x10x8xbf16>, vector<4x8x8xf32> -> vector<4x8x8xf32>
    "tpu.trace_stop"() : () -> ()
    %34 = vector.shape_cast %33 : vector<4x8x8xf32> to vector<1x4x8x8xf32>
    %c0_25 = arith.constant 0 : index
    %c0_26 = arith.constant 0 : index
    %c0_27 = arith.constant 0 : index
    %c0_28 = arith.constant 0 : index
    %35 = vector.load %arg5[%c0_25, %c0_26, %c0_27, %c0_28] : memref<1x4x8x8xf32, #tpu.memory_space<vmem>>, vector<1x4x8x8xf32>
    tpu.vector_store %arg5[%c0_25, %c0_26, %c0_27, %c0_28], %34 {strides = array<i32>} : memref<1x4x8x8xf32, #tpu.memory_space<vmem>>, vector<1x4x8x8xf32>,
    return
  }
  func.func @transform_0(%arg0: i32) -> (i32, i32, i32, i32) {
    %c0_i32 = arith.constant 0 : i32
    %c0_i32_0 = arith.constant 0 : i32
    %c0_i32_1 = arith.constant 0 : i32
    %c0_i32_2 = arith.constant 0 : i32
    return %arg0, %c0_i32, %c0_i32_0, %c0_i32_1 : i32, i32, i32, i32
  }
  func.func @transform_1(%arg0: i32) -> (i32, i32, i32, i32) {
    %c0_i32 = arith.constant 0 : i32
    %c0_i32_0 = arith.constant 0 : i32
    %c0_i32_1 = arith.constant 0 : i32
    %c0_i32_2 = arith.constant 0 : i32
    return %arg0, %c0_i32, %c0_i32_0, %c0_i32_1 : i32, i32, i32, i32
  }
  func.func @transform_2(%arg0: i32) -> (i32, i32, i32, i32) {
    %c0_i32 = arith.constant 0 : i32
    %c0_i32_0 = arith.constant 0 : i32
    %c0_i32_1 = arith.constant 0 : i32
    %c0_i32_2 = arith.constant 0 : i32
    return %arg0, %c0_i32, %c0_i32_0, %c0_i32_1 : i32, i32, i32, i32
  }
  func.func @transform_3(%arg0: i32) -> (i32, i32, i32, i32) {
    %c0_i32 = arith.constant 0 : i32
    %c0_i32_0 = arith.constant 0 : i32
    %c0_i32_1 = arith.constant 0 : i32
    %c0_i32_2 = arith.constant 0 : i32
    return %arg0, %c0_i32, %c0_i32_0, %c0_i32_1 : i32, i32, i32, i32
  }
  func.func @transform_4(%arg0: i32) -> (i32, i32, i32, i32) {
    %c0_i32 = arith.constant 0 : i32
    %c0_i32_0 = arith.constant 0 : i32
    %c0_i32_1 = arith.constant 0 : i32
    %c0_i32_2 = arith.constant 0 : i32
    return %arg0, %c0_i32, %c0_i32_0, %c0_i32_1 : i32, i32, i32, i32
  }
  func.func @transform_5(%arg0: i32) -> (i32, i32, i32, i32) {
    %c0_i32 = arith.constant 0 : i32
    %c0_i32_0 = arith.constant 0 : i32
    %c0_i32_1 = arith.constant 0 : i32
    %c0_i32_2 = arith.constant 0 : i32
    return %arg0, %c0_i32, %c0_i32_0, %c0_i32_1 : i32, i32, i32, i32
  }
}

module attributes {stable_mosaic.version = 11 : i64} {
  func.func @_ffn_add_ln_kernel(%arg0: i32, %arg1: memref<16x32xf32, #tpu.memory_space<vmem>>, %arg2: memref<32x64xf32, #tpu.memory_space<vmem>>, %arg3: memref<1x64xf32, #tpu.memory_space<vmem>>, %arg4: memref<64x32xf32, #tpu.memory_space<vmem>>, %arg5: memref<1x32xf32, #tpu.memory_space<vmem>>, %arg6: memref<1x32xf32, #tpu.memory_space<vmem>>, %arg7: memref<1x32xf32, #tpu.memory_space<vmem>>, %arg8: memref<16x32xf32, #tpu.memory_space<vmem>>) attributes {dimension_semantics = [#tpu.dimension_semantics<parallel>], iteration_bounds = array<i64: 1>, scalar_prefetch = 0 : i64, scratch_operands = 0 : i64, tpu.core_type = #tpu.core_type<tc>, window_params = [{transform_indices = @transform_0, window_bounds = array<i64: 16, 32>}, {pipeline_mode = #tpu.pipeline_mode<synchronous>, transform_indices = @transform_1, window_bounds = array<i64: 32, 64>}, {pipeline_mode = #tpu.pipeline_mode<synchronous>, transform_indices = @transform_2, window_bounds = array<i64: 1, 64>}, {pipeline_mode = #tpu.pipeline_mode<synchronous>, transform_indices = @transform_3, window_bounds = array<i64: 64, 32>}, {pipeline_mode = #tpu.pipeline_mode<synchronous>, transform_indices = @transform_4, window_bounds = array<i64: 1, 32>}, {pipeline_mode = #tpu.pipeline_mode<synchronous>, transform_indices = @transform_5, window_bounds = array<i64: 1, 32>}, {pipeline_mode = #tpu.pipeline_mode<synchronous>, transform_indices = @transform_6, window_bounds = array<i64: 1, 32>}, {transform_indices = @transform_7, window_bounds = array<i64: 16, 32>}]} {
    %c0 = arith.constant 0 : index
    %c0_0 = arith.constant 0 : index
    %0 = vector.load %arg1[%c0, %c0_0] : memref<16x32xf32, #tpu.memory_space<vmem>>, vector<16x32xf32>
    %1 = arith.truncf %0 : vector<16x32xf32> to vector<16x32xbf16>
    %c0_1 = arith.constant 0 : index
    %c0_2 = arith.constant 0 : index
    %2 = vector.load %arg2[%c0_1, %c0_2] : memref<32x64xf32, #tpu.memory_space<vmem>>, vector<32x64xf32>
    %3 = arith.truncf %2 : vector<32x64xf32> to vector<32x64xbf16>
    %cst = arith.constant dense<0.000000e+00> : vector<16x64xf32>
    %4 = tpu.matmul %1, %3, %cst {dimension_numbers = #tpu.dot_dimension_numbers<[1], [0], [0], [1], [0, 0, 1, 1], [], []>} : vector<16x32xbf16>, vector<32x64xbf16>, vector<16x64xf32> -> vector<16x64xf32>
    %c0_3 = arith.constant 0 : index
    %c0_4 = arith.constant 0 : index
    %5 = vector.load %arg3[%c0_3, %c0_4] : memref<1x64xf32, #tpu.memory_space<vmem>>, vector<1x64xf32>
    %6 = vector.broadcast %5 : vector<1x64xf32> to vector<16x64xf32>
    %7 = arith.addf %4, %6 : vector<16x64xf32>
    %cst_5 = arith.constant 0.000000e+00 : f32
    %8 = vector.broadcast %cst_5 : f32 to vector<16x64xf32>
    %9 = arith.maximumf %7, %8 : vector<16x64xf32>
    %10 = arith.truncf %9 : vector<16x64xf32> to vector<16x64xbf16>
    %c0_6 = arith.constant 0 : index
    %c0_7 = arith.constant 0 : index
    %11 = vector.load %arg4[%c0_6, %c0_7] : memref<64x32xf32, #tpu.memory_space<vmem>>, vector<64x32xf32>
    %12 = arith.truncf %11 : vector<64x32xf32> to vector<64x32xbf16>
    %cst_8 = arith.constant dense<0.000000e+00> : vector<16x32xf32>
    %13 = tpu.matmul %10, %12, %cst_8 {dimension_numbers = #tpu.dot_dimension_numbers<[1], [0], [0], [1], [0, 0, 1, 1], [], []>} : vector<16x64xbf16>, vector<64x32xbf16>, vector<16x32xf32> -> vector<16x32xf32>
    %c0_9 = arith.constant 0 : index
    %c0_10 = arith.constant 0 : index
    %14 = vector.load %arg5[%c0_9, %c0_10] : memref<1x32xf32, #tpu.memory_space<vmem>>, vector<1x32xf32>
    %15 = vector.broadcast %14 : vector<1x32xf32> to vector<16x32xf32>
    %16 = arith.addf %13, %15 : vector<16x32xf32>
    %17 = arith.addf %0, %16 : vector<16x32xf32>
    %cst_11 = arith.constant dense<0.000000e+00> : vector<16xf32>
    %18 = vector.multi_reduction <add>, %17, %cst_11 [1] : vector<16x32xf32> to vector<16xf32>
    %19 = vector.shape_cast %18 : vector<16xf32> to vector<16x1xf32>
    %cst_12 = arith.constant 3.200000e+01 : f32
    %20 = vector.broadcast %cst_12 : f32 to vector<16x1xf32>
    %21 = arith.divf %19, %20 : vector<16x1xf32>
    %22 = vector.broadcast %21 : vector<16x1xf32> to vector<16x32xf32>
    %23 = arith.subf %17, %22 : vector<16x32xf32>
    %24 = vector.broadcast %21 : vector<16x1xf32> to vector<16x32xf32>
    %25 = arith.subf %17, %24 : vector<16x32xf32>
    %26 = arith.mulf %23, %25 : vector<16x32xf32>
    %cst_13 = arith.constant dense<0.000000e+00> : vector<16xf32>
    %27 = vector.multi_reduction <add>, %26, %cst_13 [1] : vector<16x32xf32> to vector<16xf32>
    %28 = vector.shape_cast %27 : vector<16xf32> to vector<16x1xf32>
    %cst_14 = arith.constant 3.200000e+01 : f32
    %29 = vector.broadcast %cst_14 : f32 to vector<16x1xf32>
    %30 = arith.divf %28, %29 : vector<16x1xf32>
    %31 = vector.broadcast %21 : vector<16x1xf32> to vector<16x32xf32>
    %32 = arith.subf %17, %31 : vector<16x32xf32>
    %cst_15 = arith.constant 9.99999974E-6 : f32
    %33 = vector.broadcast %cst_15 : f32 to vector<16x1xf32>
    %34 = arith.addf %30, %33 : vector<16x1xf32>
    %35 = math.rsqrt %34 : vector<16x1xf32>
    %36 = vector.broadcast %35 : vector<16x1xf32> to vector<16x32xf32>
    %37 = arith.mulf %32, %36 : vector<16x32xf32>
    %c0_16 = arith.constant 0 : index
    %c0_17 = arith.constant 0 : index
    %38 = vector.load %arg6[%c0_16, %c0_17] : memref<1x32xf32, #tpu.memory_space<vmem>>, vector<1x32xf32>
    %39 = vector.broadcast %38 : vector<1x32xf32> to vector<16x32xf32>
    %40 = arith.mulf %37, %39 : vector<16x32xf32>
    %c0_18 = arith.constant 0 : index
    %c0_19 = arith.constant 0 : index
    %41 = vector.load %arg7[%c0_18, %c0_19] : memref<1x32xf32, #tpu.memory_space<vmem>>, vector<1x32xf32>
    %42 = vector.broadcast %41 : vector<1x32xf32> to vector<16x32xf32>
    %43 = arith.addf %40, %42 : vector<16x32xf32>
    %c0_20 = arith.constant 0 : index
    %c0_21 = arith.constant 0 : index
    %44 = vector.load %arg8[%c0_20, %c0_21] : memref<16x32xf32, #tpu.memory_space<vmem>>, vector<16x32xf32>
    tpu.vector_store %arg8[%c0_20, %c0_21], %43 {strides = array<i32>} : memref<16x32xf32, #tpu.memory_space<vmem>>, vector<16x32xf32>,
    return
  }
  func.func @transform_0(%arg0: i32) -> (i32, i32) {
    %c0_i32 = arith.constant 0 : i32
    %c0_i32_0 = arith.constant 0 : i32
    return %arg0, %c0_i32 : i32, i32
  }
  func.func @transform_1(%arg0: i32) -> (i32, i32) {
    %c0_i32 = arith.constant 0 : i32
    %c0_i32_0 = arith.constant 0 : i32
    %c0_i32_1 = arith.constant 0 : i32
    return %c0_i32, %c0_i32_0 : i32, i32
  }
  func.func @transform_2(%arg0: i32) -> (i32, i32) {
    %c0_i32 = arith.constant 0 : i32
    %c0_i32_0 = arith.constant 0 : i32
    %c0_i32_1 = arith.constant 0 : i32
    return %c0_i32, %c0_i32_0 : i32, i32
  }
  func.func @transform_3(%arg0: i32) -> (i32, i32) {
    %c0_i32 = arith.constant 0 : i32
    %c0_i32_0 = arith.constant 0 : i32
    %c0_i32_1 = arith.constant 0 : i32
    return %c0_i32, %c0_i32_0 : i32, i32
  }
  func.func @transform_4(%arg0: i32) -> (i32, i32) {
    %c0_i32 = arith.constant 0 : i32
    %c0_i32_0 = arith.constant 0 : i32
    %c0_i32_1 = arith.constant 0 : i32
    return %c0_i32, %c0_i32_0 : i32, i32
  }
  func.func @transform_5(%arg0: i32) -> (i32, i32) {
    %c0_i32 = arith.constant 0 : i32
    %c0_i32_0 = arith.constant 0 : i32
    %c0_i32_1 = arith.constant 0 : i32
    return %c0_i32, %c0_i32_0 : i32, i32
  }
  func.func @transform_6(%arg0: i32) -> (i32, i32) {
    %c0_i32 = arith.constant 0 : i32
    %c0_i32_0 = arith.constant 0 : i32
    %c0_i32_1 = arith.constant 0 : i32
    return %c0_i32, %c0_i32_0 : i32, i32
  }
  func.func @transform_7(%arg0: i32) -> (i32, i32) {
    %c0_i32 = arith.constant 0 : i32
    %c0_i32_0 = arith.constant 0 : i32
    return %arg0, %c0_i32 : i32, i32
  }
}

module attributes {stable_mosaic.version = 11 : i64} {
  func.func @_linear_kernel(%arg0: i32, %arg1: i32, %arg2: i32, %arg3: memref<16x32xf32, #tpu.memory_space<vmem>>, %arg4: memref<32x128xf32, #tpu.memory_space<vmem>>, %arg5: memref<1x128xf32, #tpu.memory_space<vmem>>, %arg6: memref<16x128xf32, #tpu.memory_space<vmem>>, %arg7: memref<16x128xf32, #tpu.memory_space<vmem>>) attributes {dimension_semantics = [#tpu.dimension_semantics<parallel>, #tpu.dimension_semantics<parallel>, #tpu.dimension_semantics<arbitrary>], iteration_bounds = array<i64: 1, 1, 1>, scalar_prefetch = 0 : i64, scratch_operands = 1 : i64, tpu.core_type = #tpu.core_type<tc>, window_params = [{transform_indices = @transform_0, window_bounds = array<i64: 16, 32>}, {transform_indices = @transform_1, window_bounds = array<i64: 32, 128>}, {transform_indices = @transform_2, window_bounds = array<i64: 1, 128>}, {transform_indices = @transform_3, window_bounds = array<i64: 16, 128>}]} {
    %c0_i32 = arith.constant 0 : i32
    %0 = arith.cmpi eq, %arg2, %c0_i32 : i32
    %1 = arith.extui %0 : i1 to i32
    %c0_i32_0 = arith.constant 0 : i32
    %2 = arith.cmpi ne, %1, %c0_i32_0 : i32
    scf.if %2 {
      %cst_10 = arith.constant 0.000000e+00 : f32
      %14 = vector.broadcast %cst_10 : f32 to vector<16x128xf32>
      %c0_11 = arith.constant 0 : index
      %c0_12 = arith.constant 0 : index
      %15 = vector.load %arg7[%c0_11, %c0_12] : memref<16x128xf32, #tpu.memory_space<vmem>>, vector<16x128xf32>
      tpu.vector_store %arg7[%c0_11, %c0_12], %14 {strides = array<i32>} : memref<16x128xf32, #tpu.memory_space<vmem>>, vector<16x128xf32>,
    } else {
    }
    %c0 = arith.constant 0 : index
    %c0_1 = arith.constant 0 : index
    %3 = vector.load %arg7[%c0, %c0_1] : memref<16x128xf32, #tpu.memory_space<vmem>>, vector<16x128xf32>
    %c0_2 = arith.constant 0 : index
    %c0_3 = arith.constant 0 : index
    %4 = vector.load %arg3[%c0_2, %c0_3] : memref<16x32xf32, #tpu.memory_space<vmem>>, vector<16x32xf32>
    %5 = arith.truncf %4 : vector<16x32xf32> to vector<16x32xbf16>
    %c0_4 = arith.constant 0 : index
    %c0_5 = arith.constant 0 : index
    %6 = vector.load %arg4[%c0_4, %c0_5] : memref<32x128xf32, #tpu.memory_space<vmem>>, vector<32x128xf32>
    %7 = arith.truncf %6 : vector<32x128xf32> to vector<32x128xbf16>
    %cst = arith.constant dense<0.000000e+00> : vector<16x128xf32>
    %8 = tpu.matmul %5, %7, %cst {dimension_numbers = #tpu.dot_dimension_numbers<[1], [0], [0], [1], [0, 0, 1, 1], [], []>} : vector<16x32xbf16>, vector<32x128xbf16>, vector<16x128xf32> -> vector<16x128xf32>
    %9 = arith.addf %3, %8 : vector<16x128xf32>
    %c0_6 = arith.constant 0 : index
    %c0_7 = arith.constant 0 : index
    %10 = vector.load %arg7[%c0_6, %c0_7] : memref<16x128xf32, #tpu.memory_space<vmem>>, vector<16x128xf32>
    tpu.vector_store %arg7[%c0_6, %c0_7], %9 {strides = array<i32>} : memref<16x128xf32, #tpu.memory_space<vmem>>, vector<16x128xf32>,
    %c0_i32_8 = arith.constant 0 : i32
    %11 = arith.cmpi eq, %arg2, %c0_i32_8 : i32
    %12 = arith.extui %11 : i1 to i32
    %c0_i32_9 = arith.constant 0 : i32
    %13 = arith.cmpi ne, %12, %c0_i32_9 : i32
    scf.if %13 {
      %c0_10 = arith.constant 0 : index
      %c0_11 = arith.constant 0 : index
      %14 = vector.load %arg7[%c0_10, %c0_11] : memref<16x128xf32, #tpu.memory_space<vmem>>, vector<16x128xf32>
      %c0_12 = arith.constant 0 : index
      %c0_13 = arith.constant 0 : index
      %15 = vector.load %arg5[%c0_12, %c0_13] : memref<1x128xf32, #tpu.memory_space<vmem>>, vector<1x128xf32>
      %16 = vector.broadcast %15 : vector<1x128xf32> to vector<16x128xf32>
      %17 = arith.addf %14, %16 : vector<16x128xf32>
      %c0_14 = arith.constant 0 : index
      %c0_15 = arith.constant 0 : index
      %18 = vector.load %arg6[%c0_14, %c0_15] : memref<16x128xf32, #tpu.memory_space<vmem>>, vector<16x128xf32>
      tpu.vector_store %arg6[%c0_14, %c0_15], %17 {strides = array<i32>} : memref<16x128xf32, #tpu.memory_space<vmem>>, vector<16x128xf32>,
    } else {
    }
    return
  }
  func.func @transform_0(%arg0: i32, %arg1: i32, %arg2: i32) -> (i32, i32) {
    %c0_i32 = arith.constant 0 : i32
    return %arg0, %arg2 : i32, i32
  }
  func.func @transform_1(%arg0: i32, %arg1: i32, %arg2: i32) -> (i32, i32) {
    %c0_i32 = arith.constant 0 : i32
    return %arg2, %arg1 : i32, i32
  }
  func.func @transform_2(%arg0: i32, %arg1: i32, %arg2: i32) -> (i32, i32) {
    %c0_i32 = arith.constant 0 : i32
    %c0_i32_0 = arith.constant 0 : i32
    return %c0_i32, %arg1 : i32, i32
  }
  func.func @transform_3(%arg0: i32, %arg1: i32, %arg2: i32) -> (i32, i32) {
    %c0_i32 = arith.constant 0 : i32
    return %arg0, %arg1 : i32, i32
  }
}

</mosaic_0001>

<bundles_post_ra>
// kernel: decoder_forward.17
= control target key start
LH: loop header
LB: loop body
LE: loop exit
PB: predicated region body
PF: predicated region fallthrough
CT: control target
= control target key end

     0   :  { %vm19_vm0 = vcmask 785408   ;;  %v118_v0 = vmov 0.0   ;;  %vm119_vm1 = vmmov 0   ;;  %vm33_vm2 = vcmask 261120   ;;  %s173_s1 = inlined_call_operand.vmem [shape: f32[32,96], index: 1, kind: input, shape index: {}]   ;;  %s174_s0 = inlined_call_operand.vmem [shape: f32[16,32], index: 0, kind: input, shape index: {}]   ;;  %s175_s2 = inlined_call_operand.vmem [shape: f32[1,96], index: 2, kind: input, shape index: {}]   ;;  %s176_s3 = inlined_call_operand.vmem [shape: f32[16,96], index: 3, kind: output, shape index: {}]  }
   0x1   :  { %108 = vmatprep.subr.bf16.mxu0 %v118_v0  ;;  %v29_v1 = vld [vmem:[%s173_s1 + $0x10] sm:$0xff]  ;;  %v30_v2 = vld [vmem:[%s173_s1 + $0x18] sm:$0xff]  ;;  %v27_v3 = vld [vmem:[%s173_s1] sm:$0xff]  ;;  %112 = vmatprep.mubr.msk.bf16.mxu0 %vm119_vm1, %v118_v0  ;;  %20 = vst.msk [vmem:[#allocation2] sm:$0xff] %vm19_vm0, %v118_v0 }
   0x2   :  { %21 = vst.msk [vmem:[#allocation2 + $0x8] sm:$0xff] %vm19_vm0, %v118_v0  ;;  %v32_v4 = vpack.c.bf16 %v30_v2, %v29_v1  ;;  %v28_v5 = vld [vmem:[%s173_s1 + $0x8] sm:$0xff]  ;;  %v24_v7 = vld [vmem:[%s174_s0] sm:$0xff] }
   0x3   :  { %v31_v6 = vpack.c.bf16 %v28_v5, %v27_v3  ;;  %v25_v8 = vld [vmem:[%s174_s0 + $0x8] sm:$0xff]  ;;  %v104_v18 = vld [vmem:[%s175_s2] ss:$0 sm:$0xff] }
   0x4   :  { %109 = vmatpush3.bf16.msra.mxu0 %v32_v4  ;;  %v26_v9 = vpack.c.bf16 %v25_v8, %v24_v7 }
   0x5   :  { %110 = vmatprep.subr.bf16.mxu0 %v118_v0 }
   0x8   :  { %111 = vmatpush3.bf16.msra.mxu0 %v31_v6  ;;  %v22_v10 = vld [vmem:[#allocation2] sm:$0xff] }
   0x9   :  { %v23_v14 = vld [vmem:[#allocation2 + $0x8] sm:$0xff] }
   0xb   :  { %113 = vmatmul.mubr.msk.bf16.vlgmr.msra.gmra.mxu0 %vm33_vm2, %v26_v9 }
  0xcb   :  { %v71_v11 = vpop.f32.mrf.mxu0 }
  0xcc   :  { %v78_v12 = vadd.f32 %v71_v11, %v22_v10 }
  0xcd   :  { %v114_v13 = vpop.f32.mrf.mxu0 }
  0xce   :  { %81 = vst.msk [vmem:[#allocation2] sm:$0xff] %vm19_vm0, %v78_v12 }
  0xcf   :  { %v74_v15 = vpop.f32.mrf.mxu0 }
  0xd0   :  { %v79_v16 = vadd.f32 %v74_v15, %v23_v14 }
  0xd1   :  { %v115_v17 = vpop.f32.mrf.mxu0 }
  0xd2   :  { %82 = vst.msk [vmem:[#allocation2 + $0x8] sm:$0xff] %vm19_vm0, %v79_v16 }
  0xd5   :  { %v86_v19 = vld [vmem:[#allocation2] sm:$0xff] }
  0xd6   :  { %v95_v20 = vadd.f32 %v104_v18, %v86_v19 }
  0xd8   :  { %97 = vst.msk [vmem:[%s176_s3] sm:$0xff] %vm19_vm0, %v95_v20 }
  0xd9   :  { %v87_v21 = vld [vmem:[#allocation2 + $0x8] sm:$0xff] }
  0xda   :  { %v96_v22 = vadd.f32 %v104_v18, %v87_v21 }
  0xdc   :  { %98 = vst.msk [vmem:[%s176_s3 + $0x8] sm:$0xff] %vm19_vm0, %v96_v22 }

// kernel: decoder_forward.20
= control target key start
LH: loop header
LB: loop body
LE: loop exit
PB: predicated region body
PF: predicated region fallthrough
CT: control target
= control target key end

     0   :  { %vm19_vm0 = vcmask 261120   ;;  %v117_v0 = vmov 0.0   ;;  %vm118_vm1 = vmmov 0   ;;  %s173_s1 = inlined_call_operand.vmem [shape: f32[32,32], index: 1, kind: input, shape index: {}]   ;;  %s174_s0 = inlined_call_operand.vmem [shape: f32[16,32], index: 0, kind: input, shape index: {}]   ;;  %s175_s2 = inlined_call_operand.vmem [shape: f32[1,32], index: 2, kind: input, shape index: {}]   ;;  %s176_s3 = inlined_call_operand.vmem [shape: f32[16,32], index: 3, kind: output, shape index: {}]  }
   0x1   :  { %107 = vmatprep.subr.bf16.mxu0 %v117_v0  ;;  %v29_v1 = vld [vmem:[%s173_s1 + $0x10] sm:$0xff]  ;;  %v30_v2 = vld [vmem:[%s173_s1 + $0x18] sm:$0xff]  ;;  %v27_v3 = vld [vmem:[%s173_s1] sm:$0xff]  ;;  %111 = vmatprep.mubr.msk.bf16.mxu0 %vm118_vm1, %v117_v0  ;;  %20 = vst.msk [vmem:[#allocation2] sm:$0xff] %vm19_vm0, %v117_v0 }
   0x2   :  { %21 = vst.msk [vmem:[#allocation2 + $0x8] sm:$0xff] %vm19_vm0, %v117_v0  ;;  %v32_v4 = vpack.c.bf16 %v30_v2, %v29_v1  ;;  %v28_v5 = vld [vmem:[%s173_s1 + $0x8] sm:$0xff]  ;;  %v24_v7 = vld [vmem:[%s174_s0] sm:$0xff] }
   0x3   :  { %v31_v6 = vpack.c.bf16 %v28_v5, %v27_v3  ;;  %v25_v8 = vld [vmem:[%s174_s0 + $0x8] sm:$0xff]  ;;  %v103_v18 = vld [vmem:[%s175_s2] ss:$0 sm:$0xff] }
   0x4   :  { %108 = vmatpush3.bf16.msra.mxu0 %v32_v4  ;;  %v26_v9 = vpack.c.bf16 %v25_v8, %v24_v7 }
   0x5   :  { %109 = vmatprep.subr.bf16.mxu0 %v117_v0 }
   0x8   :  { %110 = vmatpush3.bf16.msra.mxu0 %v31_v6  ;;  %v22_v10 = vld [vmem:[#allocation2] sm:$0xff] }
   0x9   :  { %v23_v14 = vld [vmem:[#allocation2 + $0x8] sm:$0xff] }
   0xb   :  { %112 = vmatmul.mubr.msk.bf16.vlgmr.msra.gmra.mxu0 %vm19_vm0, %v26_v9 }
  0xcb   :  { %v71_v11 = vpop.f32.mrf.mxu0 }
  0xcc   :  { %v78_v12 = vadd.f32 %v71_v11, %v22_v10 }
  0xcd   :  { %v113_v13 = vpop.f32.mrf.mxu0 }
  0xce   :  { %80 = vst.msk [vmem:[#allocation2] sm:$0xff] %vm19_vm0, %v78_v12 }
  0xcf   :  { %v74_v15 = vpop.f32.mrf.mxu0 }
  0xd0   :  { %v79_v16 = vadd.f32 %v74_v15, %v23_v14 }
  0xd1   :  { %v114_v17 = vpop.f32.mrf.mxu0 }
  0xd2   :  { %81 = vst.msk [vmem:[#allocation2 + $0x8] sm:$0xff] %vm19_vm0, %v79_v16 }
  0xd5   :  { %v85_v19 = vld [vmem:[#allocation2] sm:$0xff] }
  0xd6   :  { %v94_v20 = vadd.f32 %v103_v18, %v85_v19 }
  0xd8   :  { %96 = vst.msk [vmem:[%s176_s3] sm:$0xff] %vm19_vm0, %v94_v20 }
  0xd9   :  { %v86_v21 = vld [vmem:[#allocation2 + $0x8] sm:$0xff] }
  0xda   :  { %v95_v22 = vadd.f32 %v103_v18, %v86_v21 }
  0xdc   :  { %97 = vst.msk [vmem:[%s176_s3 + $0x8] sm:$0xff] %vm19_vm0, %v95_v22 }

// kernel: decoder_forward.19
= control target key start
LH: loop header
LB: loop body
LE: loop exit
PB: predicated region body
PF: predicated region fallthrough
CT: control target
= control target key end

     0   :  { %v161_v0 = vmov 0.0   ;;  %vm162_vm0 = vmmov 0   ;;  %vm40_vm1 = vcmask 261120   ;;  %s244_s1 = inlined_call_operand.vmem [shape: f32[32,32], index: 1, kind: input, shape index: {}]   ;;  %s245_s0 = inlined_call_operand.vmem [shape: f32[16,32], index: 0, kind: input, shape index: {}]   ;;  %s246_s2 = inlined_call_operand.vmem [shape: f32[1,32], index: 2, kind: input, shape index: {}]   ;;  %s247_s3 = inlined_call_operand.vmem [shape: f32[16,32], index: 3, kind: input, shape index: {}]   ;;  %s248_s4 = inlined_call_operand.vmem [shape: f32[1,32], index: 4, kind: input, shape index: {}]   ;;  %s249_s5 = inlined_call_operand.vmem [shape: f32[1,32], index: 5, kind: input, shape index: {}]   ;;  %s250_s6 = inlined_call_operand.vmem [shape: f32[16,32], index: 6, kind: output, shape index: {}]  }
   0x1   :  { %147 = vmatprep.subr.bf16.mxu0 %v161_v0  ;;  %v29_v1 = vld [vmem:[%s244_s1 + $0x10] sm:$0xff]  ;;  %v30_v2 = vld [vmem:[%s244_s1 + $0x18] sm:$0xff]  ;;  %v27_v3 = vld [vmem:[%s244_s1] sm:$0xff]  ;;  %151 = vmatprep.mubr.msk.bf16.mxu0 %vm162_vm0, %v161_v0 }
   0x2   :  { %v32_v4 = vpack.c.bf16 %v30_v2, %v29_v1  ;;  %v28_v5 = vld [vmem:[%s244_s1 + $0x8] sm:$0xff]  ;;  %v24_v7 = vld [vmem:[%s245_s0] sm:$0xff] }
   0x3   :  { %v31_v6 = vpack.c.bf16 %v28_v5, %v27_v3  ;;  %v25_v8 = vld [vmem:[%s245_s0 + $0x8] sm:$0xff]  ;;  %v140_v10 = vld [vmem:[%s246_s2] ss:$0 sm:$0xff] }
   0x4   :  { %148 = vmatpush3.bf16.msra.mxu0 %v32_v4  ;;  %v26_v9 = vpack.c.bf16 %v25_v8, %v24_v7  ;;  %v85_v12 = vld [vmem:[%s247_s3] sm:$0xff]  ;;  %v86_v17 = vld [vmem:[%s247_s3 + $0x8] sm:$0xff] }
   0x5   :  { %149 = vmatprep.subr.bf16.mxu0 %v161_v0  ;;  %v142_v40 = vld [vmem:[%s248_s4] ss:$0 sm:$0xff] }
   0x6   :  { %v143_v42 = vld [vmem:[%s249_s5] ss:$0 sm:$0xff] }
   0x8   :  { %150 = vmatpush3.bf16.msra.mxu0 %v31_v6 }
   0xb   :  { %152 = vmatmul.mubr.msk.bf16.vlgmr.msra.gmra.mxu0 %vm40_vm1, %v26_v9 }
  0xcb   :  { %v78_v11 = vpop.f32.mrf.mxu0 }
  0xcc   :  { %v79_v13 = vadd.f32 %v140_v10, %v78_v11 }
  0xcd   :  { %v153_v14 = vpop.f32.mrf.mxu0 }
  0xce   :  { %v87_v15 = vadd.f32 %v85_v12, %v79_v13 }
  0xcf   :  { %v81_v16 = vpop.f32.mrf.mxu0 }
  0xd0   :  { %v82_v18 = vadd.f32 %v140_v10, %v81_v16  ;;  %v89_v19 = vsel %vm40_vm1, %v87_v15, 0.0 }
  0xd1   :  { %90 = vadd.xlane.f32.xlu0 %v89_v19  ;;  %v154_v20 = vpop.f32.mrf.mxu0 }
  0xd2   :  { %v88_v21 = vadd.f32 %v86_v17, %v82_v18 }
  0xd4   :  { %v92_v22 = vsel %vm40_vm1, %v88_v21, 0.0 }
  0xd5   :  { %93 = vadd.xlane.f32.xlu0 %v92_v22 }
 0x15a   :  { %v91_v23 = vpop.xlane.xlu0 %90 }
 0x15b   :  { %v96_v24 = vmul.f32 0.03125, %v91_v23 }
 0x15d   :  { %v98_v25 = vsub.f32 %v87_v15, %v96_v24 }
 0x15e   :  { %v94_v26 = vpop.xlane.xlu0 %93 }
 0x15f   :  { %v97_v27 = vmul.f32 0.03125, %v94_v26  ;;  %v100_v28 = vmul.f32 %v98_v25, %v98_v25 }
 0x161   :  { %v99_v29 = vsub.f32 %v88_v21, %v97_v27  ;;  %v102_v30 = vsel %vm40_vm1, %v100_v28, 0.0 }
 0x162   :  { %103 = vadd.xlane.f32.xlu1 %v102_v30 }
 0x163   :  { %v101_v31 = vmul.f32 %v99_v29, %v99_v29 }
 0x165   :  { %v105_v32 = vsel %vm40_vm1, %v101_v31, 0.0 }
 0x166   :  { %106 = vadd.xlane.f32.xlu1 %v105_v32 }
 0x1eb   :  { %v104_v33 = vpop.xlane.xlu1 %103 }
 0x1ec   :  { %v108_v34 = vmul.f32 0.03125, %v104_v33 }
 0x1ee   :  { %v110_v35 = vadd.f32 1e-05, %v108_v34 }
 0x1ef   :  { %v107_v36 = vpop.xlane.xlu1 %106 }
 0x1f0   :  { %157 = vrsqrt.f32 %v110_v35  ;;  %v109_v37 = vmul.f32 0.03125, %v107_v36 }
 0x1f2   :  { %v111_v38 = vadd.f32 1e-05, %v109_v37 }
 0x1f4   :  { %159 = vrsqrt.f32 %v111_v38 }
 0x1fd   :  { %v158_v39 = vpop.eup %157 }
 0x1fe   :  { %v114_v41 = vmul.f32 %v158_v39, %v98_v25 }
 0x200   :  { %v123_v43 = vmul.f32 %v142_v40, %v114_v41 }
 0x201   :  { %v160_v44 = vpop.eup %159 }
 0x202   :  { %v132_v45 = vadd.f32 %v143_v42, %v123_v43  ;;  %v115_v46 = vmul.f32 %v160_v44, %v99_v29 }
 0x204   :  { %134 = vst.msk [vmem:[%s250_s6] sm:$0xff] %vm40_vm1, %v132_v45  ;;  %v124_v47 = vmul.f32 %v142_v40, %v115_v46 }
 0x206   :  { %v133_v48 = vadd.f32 %v143_v42, %v124_v47 }
 0x208   :  { %135 = vst.msk [vmem:[%s250_s6 + $0x8] sm:$0xff] %vm40_vm1, %v133_v48 }

// kernel: decoder_forward.18
= control target key start
LH: loop header
LB: loop body
LE: loop exit
PB: predicated region body
PF: predicated region fallthrough
CT: control target
= control target key end

     0   :  { %s958_s15 = smov 0   ;;  %s1046_s0 = inlined_call_operand.vmem [shape: f32[2,4,8,8], index: 0, kind: input, shape index: {}]   ;;  %s1047_s1 = inlined_call_operand.vmem [shape: f32[2,4,8,8], index: 1, kind: input, shape index: {}]   ;;  %s1048_s2 = inlined_call_operand.vmem [shape: f32[2,4,8,8], index: 2, kind: input, shape index: {}]   ;;  %s1049_s3 = inlined_call_operand.vmem [shape: f32[2,1,8,8], index: 3, kind: input, shape index: {}]   ;;  %s1050_s4 = inlined_call_operand.vmem [shape: f32[2,4,8,8], index: 4, kind: output, shape index: {}]  }
   0x1 LB: > { %s805_s16 = sadd.s32 4294967295, %s929_s15   ;;  %p809_p0 = scmp.ge.s32.totalorder %s929_s15, 1  ;;  %s929_s15 = sphi %s958_s15, %s14_s15  }
   0x2   : > { %p191_p1 = scmp.lt.s32.totalorder %s929_s15, 3 }
   0x4   : > { %p192_p2 = pnand %p809_p0, %p191_p1 }
   0x5   : > { %p231_p3 = scmp.lt.s32.totalorder (!%p192_p2), %s805_s16, 1 }
   0x6   : > { %195 = sbr.rel (%p192_p2) target bundleno = 744 (0x2e8), region = 36 }
   0xb   : > { %v931_v0 = vmov 0.0   ;;  %s1052_s16 = smov (!%p231_p3, %s805_s16), 1  ;;  %vm932_vm0 = vmmov 0   ;;  %vm281_vm1 = vcmask 64512   ;;  %vm528_vm3 = vcmask 1043456  }
   0xc   : > { %849 = vmatprep.subr.bf16.mxu0 %v931_v0  ;;  %855 = vmatprep.subr.bf16.mxu1 %v931_v0  ;;  %s975_s17 = sshll.u32 %s1052_s16, 5  ;;  %s816_s24 = sshll.u32 %s1052_s16, 3 }
   0xd   : > { %851 = vmatprep.mubr.msk.bf16.mxu0 %vm932_vm0, %v931_v0  ;;  %857 = vmatprep.mubr.msk.bf16.mxu1 %vm932_vm0, %v931_v0  ;;  %s240_s20 = scalar_lea.vmem %s1047_s1, %s975_s17  ;;  %s235_s23 = scalar_lea.vmem %s1046_s0, %s975_s17 }
   0xe   : > { %v264_v1 = vld [vmem:[%s240_s20] sm:$0xff]  ;;  %v265_v2 = vld [vmem:[%s240_s20 + $0x8] sm:$0xff]  ;;  %v266_v7 = vld [vmem:[%s240_s20 + $0x10] sm:$0xff]  ;;  %s249_s27 = scalar_lea.vmem %s1049_s3, %s816_s24  ;;  %s245_s30 = scalar_lea.vmem %s1048_s2, %s975_s17 }
   0xf   : > { %v256_v3 = vld [vmem:[%s235_s23] sm:$0xff]  ;;  %v277_v4 = vpack.c.bf16 %v264_v1, %v264_v1  ;;  %v278_v5 = vpack.c.bf16 %v265_v2, %v265_v2  ;;  %v257_v6 = vld [vmem:[%s235_s23 + $0x8] sm:$0xff]  ;;  %v267_v8 = vld [vmem:[%s240_s20 + $0x18] sm:$0xff]  ;;  %v279_v13 = vpack.c.bf16 %v266_v7, %v266_v7  ;;  %s254_s7 = scalar_lea.vmem %s1050_s4, %s975_s17 }
  0x10   : > { %v260_v11 = vmul.f32 0.35355338, %v256_v3  ;;  %v261_v12 = vmul.f32 0.35355338, %v257_v6  ;;  %v280_v14 = vpack.c.bf16 %v267_v8, %v267_v8  ;;  %v258_v17 = vld [vmem:[%s235_s23 + $0x10] sm:$0xff]  ;;  %v259_v18 = vld [vmem:[%s235_s23 + $0x18] sm:$0xff] }
  0x11   : > { %v286_v9 = vsel %vm281_vm1, %v277_v4, 0  ;;  %v332_v10 = vsel %vm281_vm1, %v278_v5, 0  ;;  %v378_v19 = vsel %vm281_vm1, %v279_v13, 0  ;;  %v262_v21 = vmul.f32 0.35355338, %v258_v17  ;;  %v272_v25 = vld [vmem:[%s249_s27] sm:$0xff] }
  0x12   : > { %850 = vmatpush3.bf16.xpose.msra.mxu0 %v286_v9  ;;  %856 = vmatpush3.bf16.xpose.msra.mxu1 %v332_v10  ;;  %v273_v15 = vpack.c.bf16 %v260_v11, %v260_v11  ;;  %v274_v16 = vpack.c.bf16 %v261_v12, %v261_v12  ;;  %v424_v20 = vsel %vm281_vm1, %v280_v14, 0  ;;  %v263_v22 = vmul.f32 0.35355338, %v259_v18  ;;  %v268_v7 = vld [vmem:[%s245_s30] sm:$0xff]  ;;  %v269_v9 = vld [vmem:[%s245_s30 + $0x8] sm:$0xff]  ;;  %v270_v13 = vld [vmem:[%s245_s30 + $0x10] sm:$0xff] }
  0x13   : > { %861 = vmatprep.subr.bf16.mxu0 %v931_v0  ;;  %867 = vmatprep.subr.bf16.mxu1 %v931_v0  ;;  %v275_v23 = vpack.c.bf16 %v262_v21, %v262_v21  ;;  %vm466_vm2 = vcmp.eq.f32.partialorder %v272_v25, 0.0  ;;  %v521_v8 = vpack.c.bf16 %v268_v7, %v268_v7  ;;  %v522_v10 = vpack.c.bf16 %v269_v9, %v269_v9 }
  0x14   : > { %v276_v24 = vpack.c.bf16 %v263_v22, %v263_v22  ;;  %v523_v14 = vpack.c.bf16 %v270_v13, %v270_v13 }
  0x15   : > { %v530_v11 = vsel %vm528_vm3, %v521_v8, 0  ;;  %v576_v12 = vsel %vm528_vm3, %v522_v10, 0 }
  0x19   : > { %852 = vmatmul.mubr.msk.bf16.vlgmr.msra.gmra.mxu0 %vm281_vm1, %v273_v15  ;;  %858 = vmatmul.mubr.msk.bf16.vlgmr.msra.gmra.mxu1 %vm281_vm1, %v274_v16  ;;  %v622_v15 = vsel %vm528_vm3, %v523_v14, 0  ;;  %v271_v16 = vld [vmem:[%s245_s30 + $0x18] sm:$0xff] }
  0x1a   : > { %862 = vmatpush3.bf16.xpose.msra.mxu0 %v378_v19  ;;  %868 = vmatpush3.bf16.xpose.msra.mxu1 %v424_v20  ;;  %v524_v17 = vpack.c.bf16 %v271_v16, %v271_v16 }
  0x1b   : > { %863 = vmatprep.mubr.msk.bf16.mxu0 %vm932_vm0, %v931_v0  ;;  %869 = vmatprep.mubr.msk.bf16.mxu1 %vm932_vm0, %v931_v0 }
  0x1c   : > { %873 = vmatprep.subr.bf16.mxu0 %v931_v0  ;;  %879 = vmatprep.subr.bf16.mxu1 %v931_v0  ;;  %v668_v18 = vsel %vm528_vm3, %v524_v17, 0 }
  0x21   : > { %864 = vmatmul.mubr.msk.bf16.vlgmr.msra.gmra.mxu0 %vm281_vm1, %v275_v23  ;;  %870 = vmatmul.mubr.msk.bf16.vlgmr.msra.gmra.mxu1 %vm281_vm1, %v276_v24 }
  0x22   : > { %875 = vmatprep.mubr.msk.bf16.mxu0 %vm932_vm0, %v931_v0  ;;  %881 = vmatprep.mubr.msk.bf16.mxu1 %vm932_vm0, %v931_v0 }
  0x23   : > { %874 = vmatpush3.bf16.msra.mxu0 %v530_v11  ;;  %880 = vmatpush3.bf16.msra.mxu1 %v576_v12 }
  0x24   : > { %885 = vmatprep.subr.bf16.mxu0 %v931_v0  ;;  %891 = vmatprep.subr.bf16.mxu1 %v931_v0 }
  0xd9   : > { %v322_v26 = vpop.f32.mrf.mxu0  ;;  %v368_v27 = vpop.f32.mrf.mxu1 }
  0xda   : > { %v469_v28 = vsel %vm466_vm2, -1e+10, %v322_v26  ;;  %v470_v29 = vsel %vm466_vm2, -1e+10, %v368_v27 }
  0xdb   : > { %v853_v30 = vpop.f32.mrf.mxu0  ;;  %v859_v31 = vpop.f32.mrf.mxu1  ;;  %v473_v32 = vsel %vm281_vm1, %v469_v28, -inf  ;;  %v476_v35 = vsel %vm281_vm1, %v470_v29, -inf }
  0xdc   : > { %474 = vmax.xlane.f32.xlu0 %v473_v32 }
  0xdd   : > { %v325_v33 = vpop.f32.mrf.mxu0  ;;  %v371_v34 = vpop.f32.mrf.mxu1 }
  0xdf   : > { %v854_v36 = vpop.f32.mrf.mxu0  ;;  %v860_v37 = vpop.f32.mrf.mxu1 }
  0xe0   : > { %477 = vmax.xlane.f32.xlu0 %v476_v35 }
  0xe1   : > { %v414_v38 = vpop.f32.mrf.mxu0  ;;  %v460_v39 = vpop.f32.mrf.mxu1 }
  0xe2   : > { %v471_v40 = vsel %vm466_vm2, -1e+10, %v414_v38  ;;  %v472_v41 = vsel %vm466_vm2, -1e+10, %v460_v39 }
  0xe3   : > { %v865_v42 = vpop.f32.mrf.mxu0  ;;  %v871_v43 = vpop.f32.mrf.mxu1  ;;  %v479_v44 = vsel %vm281_vm1, %v471_v40, -inf  ;;  %v482_v47 = vsel %vm281_vm1, %v472_v41, -inf }
  0xe4   : > { %480 = vmax.xlane.f32.xlu1 %v479_v44 }
  0xe5   : > { %v417_v45 = vpop.f32.mrf.mxu0  ;;  %v463_v46 = vpop.f32.mrf.mxu1 }
  0xe7   : > { %v866_v48 = vpop.f32.mrf.mxu0  ;;  %v872_v49 = vpop.f32.mrf.mxu1 }
  0xe8   : > { %483 = vmax.xlane.f32.xlu1 %v482_v47 }
 0x165   : > { %v475_v50 = vpop.xlane.xlu0 %474 }
 0x166   : > { %v485_v51 = vsub.f32 %v469_v28, %v475_v50 }
 0x168   : > { %v489_v52 = vmul.f32 1.442695, %v485_v51 }
 0x169   : > { %v478_v53 = vpop.xlane.xlu0 %477 }
 0x16a   : > { %907 = vpow2.f32 %v489_v52  ;;  %v486_v54 = vsub.f32 %v470_v29, %v478_v53 }
 0x16c   : > { %v491_v55 = vmul.f32 1.442695, %v486_v54 }
 0x16d   : > { %v481_v56 = vpop.xlane.xlu1 %480 }
 0x16e   : > { %909 = vpow2.f32 %v491_v55  ;;  %v487_v57 = vsub.f32 %v471_v40, %v481_v56 }
 0x170   : > { %v493_v58 = vmul.f32 1.442695, %v487_v57 }
 0x171   : > { %v484_v59 = vpop.xlane.xlu1 %483 }
 0x172   : > { %911 = vpow2.f32 %v493_v58  ;;  %v488_v60 = vsub.f32 %v472_v41, %v484_v59 }
 0x174   : > { %v495_v61 = vmul.f32 1.442695, %v488_v60 }
 0x176   : > { %913 = vpow2.f32 %v495_v61 }
 0x177   : > { %v908_v62 = vpop.eup %907 }
 0x178   : > { %v497_v63 = vsel %vm281_vm1, %v908_v62, 0.0 }
 0x179   : > { %498 = vadd.xlane.f32.xlu0 %v497_v63 }
 0x17b   : > { %v910_v1 = vpop.eup %909 }
 0x17c   : > { %v500_v2 = vsel %vm281_vm1, %v910_v1, 0.0 }
 0x17d   : > { %501 = vadd.xlane.f32.xlu1 %v500_v2 }
 0x17f   : > { %v912_v3 = vpop.eup %911 }
 0x180   : > { %v503_v4 = vsel %vm281_vm1, %v912_v3, 0.0 }
 0x181   : > { %504 = vadd.xlane.f32.xlu0 %v503_v4 }
 0x183   : > { %v914_v5 = vpop.eup %913 }
 0x184   : > { %v506_v6 = vsel %vm281_vm1, %v914_v5, 0.0 }
 0x185   : > { %507 = vadd.xlane.f32.xlu1 %v506_v6 }
 0x202   : > { %v499_v19 = vpop.xlane.xlu0 %498 }
 0x203   : > { %915 = vrcp.f32 %v499_v19 }
 0x206   : > { %v502_v20 = vpop.xlane.xlu1 %501 }
 0x207   : > { %917 = vrcp.f32 %v502_v20 }
 0x20a   : > { %v505_v21 = vpop.xlane.xlu0 %504 }
 0x20b   : > { %919 = vrcp.f32 %v505_v21 }
 0x20e   : > { %v508_v22 = vpop.xlane.xlu1 %507 }
 0x20f   : > { %921 = vrcp.f32 %v508_v22 }
 0x210   : > { %v916_v23 = vpop.eup %915 }
 0x211   : > { %v513_v24 = vmul.f32 %v916_v23, %v908_v62 }
 0x213   : > { %v517_v25 = vpack.c.bf16 %v513_v24, %v513_v24 }
 0x214   : > { %v918_v26 = vpop.eup %917 }
 0x215   : > { %876 = vmatmul.mubr.msk.bf16.vlgmr.msra.gmra.mxu0 %vm281_vm1, %v517_v25  ;;  %v514_v27 = vmul.f32 %v918_v26, %v910_v1 }
 0x216   : > { %886 = vmatpush3.bf16.msra.mxu0 %v622_v15  ;;  %887 = vmatprep.mubr.msk.bf16.mxu0 %vm932_vm0, %v931_v0 }
 0x217   : > { %v518_v28 = vpack.c.bf16 %v514_v27, %v514_v27 }
 0x218   : > { %v920_v29 = vpop.eup %919 }
 0x219   : > { %882 = vmatmul.mubr.msk.bf16.vlgmr.msra.gmra.mxu1 %vm281_vm1, %v518_v28  ;;  %v515_v30 = vmul.f32 %v920_v29, %v912_v3 }
 0x21a   : > { %892 = vmatpush3.bf16.msra.mxu1 %v668_v18  ;;  %893 = vmatprep.mubr.msk.bf16.mxu1 %vm932_vm0, %v931_v0 }
 0x21b   : > { %v519_v31 = vpack.c.bf16 %v515_v30, %v515_v30 }
 0x21c   : > { %v922_v32 = vpop.eup %921 }
 0x21d   : > { %888 = vmatmul.mubr.msk.bf16.vlgmr.msra.gmra.mxu0 %vm281_vm1, %v519_v31  ;;  %v516_v33 = vmul.f32 %v922_v32, %v914_v5 }
 0x21f   : > { %v520_v34 = vpack.c.bf16 %v516_v33, %v516_v33 }
 0x221   : > { %894 = vmatmul.mubr.msk.bf16.vlgmr.msra.gmra.mxu1 %vm281_vm1, %v520_v34 }
 0x2d5   : > { %v566_v35 = vpop.f32.mrf.mxu0 }
 0x2d6   : > { %710 = vst.msk [vmem:[%s254_s7] sm:$0xff] %vm281_vm1, %v566_v35 }
 0x2d7   : > { %v877_v36 = vpop.f32.mrf.mxu0 }
 0x2d9   : > { %v569_v37 = vpop.f32.mrf.mxu0  ;;  %v612_v38 = vpop.f32.mrf.mxu1 }
 0x2da   : > { %711 = vst.msk [vmem:[%s254_s7 + $0x8] sm:$0xff] %vm281_vm1, %v612_v38 }
 0x2db   : > { %v878_v0 = vpop.f32.mrf.mxu0  ;;  %v883_v39 = vpop.f32.mrf.mxu1 }
 0x2dd   : > { %v615_v40 = vpop.f32.mrf.mxu1  ;;  %v658_v41 = vpop.f32.mrf.mxu0 }
 0x2de   : > { %712 = vst.msk [vmem:[%s254_s7 + $0x10] sm:$0xff] %vm281_vm1, %v658_v41 }
 0x2df   : > { %v884_v42 = vpop.f32.mrf.mxu1  ;;  %v889_v43 = vpop.f32.mrf.mxu0 }
 0x2e1   : > { %v661_v44 = vpop.f32.mrf.mxu0  ;;  %v704_v45 = vpop.f32.mrf.mxu1 }
 0x2e2   : > { %713 = vst.msk [vmem:[%s254_s7 + $0x18] sm:$0xff] %vm281_vm1, %v704_v45 }
 0x2e3   : > { %v890_v46 = vpop.f32.mrf.mxu0  ;;  %v895_v47 = vpop.f32.mrf.mxu1 }
 0x2e5   : > { %v707_v48 = vpop.f32.mrf.mxu1 }
 0x2e7   : > { %v896_v49 = vpop.f32.mrf.mxu1 }
 0x2e8 PF: > { %s14_s15 = sadd.s32 1, %s929_s15  }
 0x2e9   : > { %p11_p4 = scmp.ge.s32.totalorder %s14_s15, 4  }
 0x2eb   :  { %13 = sbr.rel (!%p11_p4) target bundleno = 1 (0x1), region = 75 }

// kernel: decoder_forward.21
= control target key start
LH: loop header
LB: loop body
LE: loop exit
PB: predicated region body
PF: predicated region fallthrough
CT: control target
= control target key end

     0   :  { %vm22_vm0 = vcmask 519168   ;;  %v140_v3 = vmov 0.0   ;;  %vm38_vm1 = vcmask 261120   ;;  %vm19_vm2 = vcmask 523264   ;;  %s203_s1 = inlined_call_operand.vmem [shape: f32[32,64], index: 1, kind: input, shape index: {}]   ;;  %s204_s0 = inlined_call_operand.vmem [shape: f32[20,32], index: 0, kind: input, shape index: {}]   ;;  %s205_s2 = inlined_call_operand.vmem [shape: f32[1,64], index: 2, kind: input, shape index: {}]   ;;  %s206_s3 = inlined_call_operand.vmem [shape: f32[20,64], index: 3, kind: output, shape index: {}]  }
   0x1   :  { %v34_v0 = vld [vmem:[%s203_s1 + $0x10] sm:$0xff]  ;;  %v35_v1 = vld [vmem:[%s203_s1 + $0x18] sm:$0xff]  ;;  %v32_v2 = vld [vmem:[%s203_s1] sm:$0xff]  ;;  %23 = vst.msk [vmem:[#allocation2 + $0x10] sm:$0xf] %vm22_vm0, %v140_v3 }
   0x2   :  { %v37_v4 = vpack.c.bf16 %v35_v1, %v34_v0  ;;  %v33_v5 = vld [vmem:[%s203_s1 + $0x8] sm:$0xff]  ;;  %v27_v6 = vld [vmem:[%s204_s0] sm:$0xff]  ;;  %v29_v10 = vld [vmem:[%s204_s0 + $0x10] sm:$0xf]  ;;  %20 = vst.msk [vmem:[#allocation2] sm:$0xff] %vm19_vm2, %v140_v3 }
   0x3   :  { %v28_v7 = vld [vmem:[%s204_s0 + $0x8] sm:$0xff]  ;;  %v36_v8 = vpack.c.bf16 %v33_v5, %v32_v2  ;;  %v31_v11 = vpack.c.bf16 %v29_v10, %v29_v10  ;;  %21 = vst.msk [vmem:[#allocation2 + $0x8] sm:$0xff] %vm19_vm2, %v140_v3  ;;  %v126_v22 = vld [vmem:[%s205_s2] ss:$0 sm:$0xff] }
   0x4   :  { %v30_v9 = vpack.c.bf16 %v28_v7, %v27_v6  ;;  %131 = vmatprep.subr.bf16.mxu0 %v37_v4 }
   0x5   :  { %132 = vmatpush3.bf16.msra.mxu0 %v37_v4 }
   0x6   :  { %135 = vmatprep.mubr.msk.bf16.mxu0 %vm38_vm1, %v30_v9  ;;  %133 = vmatprep.subr.bf16.mxu0 %v36_v8 }
   0x8   :  { %v26_v12 = vld [vmem:[#allocation2 + $0x10] sm:$0xf] }
   0x9   :  { %134 = vmatpush3.bf16.msra.mxu0 %v36_v8  ;;  %v24_v14 = vld [vmem:[#allocation2] sm:$0xff] }
   0xa   :  { %v25_v19 = vld [vmem:[#allocation2 + $0x8] sm:$0xff] }
   0xc   :  { %136 = vmatmul.mubr.msk.bf16.vlgmr.msra.gmra.mxu0 %vm38_vm1, %v31_v11 }
  0xcc   :  { %v137_v13 = vpop.f32.mrf.mxu0 }
  0xcd   :  { %v95_v15 = vadd.f32 %v137_v13, %v26_v12 }
  0xce   :  { %v79_v16 = vpop.f32.mrf.mxu0 }
  0xcf   :  { %100 = vst.msk [vmem:[#allocation2 + $0x10] sm:$0xf] %vm22_vm0, %v95_v15  ;;  %v93_v17 = vadd.f32 %v79_v16, %v24_v14 }
  0xd0   :  { %v138_v18 = vpop.f32.mrf.mxu0 }
  0xd1   :  { %97 = vst.msk [vmem:[#allocation2] sm:$0xff] %vm19_vm2, %v93_v17 }
  0xd2   :  { %v82_v20 = vpop.f32.mrf.mxu0 }
  0xd3   :  { %v94_v21 = vadd.f32 %v82_v20, %v25_v19 }
  0xd5   :  { %98 = vst.msk [vmem:[#allocation2 + $0x8] sm:$0xff] %vm19_vm2, %v94_v21 }
  0xd6   :  { %v106_v23 = vld [vmem:[#allocation2 + $0x10] sm:$0xf] }
  0xd7   :  { %v116_v24 = vadd.f32 %v126_v22, %v106_v23 }
  0xd8   :  { %v104_v25 = vld [vmem:[#allocation2] sm:$0xff] }
  0xd9   :  { %119 = vst.msk [vmem:[%s206_s3 + $0x10] sm:$0xf] %vm22_vm0, %v116_v24  ;;  %v114_v26 = vadd.f32 %v126_v22, %v104_v25 }
  0xdb   :  { %117 = vst.msk [vmem:[%s206_s3] sm:$0xff] %vm19_vm2, %v114_v26 }
  0xdc   :  { %v105_v27 = vld [vmem:[#allocation2 + $0x8] sm:$0xff] }
  0xdd   :  { %v115_v28 = vadd.f32 %v126_v22, %v105_v27 }
  0xdf   :  { %118 = vst.msk [vmem:[%s206_s3 + $0x8] sm:$0xff] %vm19_vm2, %v115_v28 }

// kernel: decoder_forward.22
= control target key start
LH: loop header
LB: loop body
LE: loop exit
PB: predicated region body
PF: predicated region fallthrough
CT: control target
= control target key end

     0   :  { %s967_s15 = smov 0   ;;  %s1062_s0 = inlined_call_operand.vmem [shape: f32[2,4,8,8], index: 0, kind: input, shape index: {}]   ;;  %s1063_s1 = inlined_call_operand.vmem [shape: f32[2,4,10,8], index: 1, kind: input, shape index: {}]   ;;  %s1064_s2 = inlined_call_operand.vmem [shape: f32[2,4,10,8], index: 2, kind: input, shape index: {}]   ;;  %s1065_s3 = inlined_call_operand.vmem [shape: f32[2,1,8,10], index: 3, kind: input, shape index: {}]   ;;  %s1066_s4 = inlined_call_operand.vmem [shape: f32[2,4,8,8], index: 4, kind: output, shape index: {}]  }
   0x1 LB: > { %s814_s16 = sadd.s32 4294967295, %s938_s15   ;;  %p818_p0 = scmp.ge.s32.totalorder %s938_s15, 1  ;;  %s938_s15 = sphi %s967_s15, %s14_s15  }
   0x2   : > { %p191_p1 = scmp.lt.s32.totalorder %s938_s15, 3 }
   0x4   : > { %p192_p2 = pnand %p818_p0, %p191_p1 }
   0x5   : > { %p231_p3 = scmp.lt.s32.totalorder (!%p192_p2), %s814_s16, 1 }
   0x6   : > { %195 = sbr.rel (%p192_p2) target bundleno = 744 (0x2e8), region = 36 }
   0xb   : > { %v940_v0 = vmov 0.0   ;;  %s1068_s16 = smov (!%p231_p3, %s814_s16), 1  ;;  %vm941_vm0 = vmmov 0   ;;  %vm289_vm1 = vcmask 64512   ;;  %vm481_vm3 = vcmask 80896  }
   0xc   : > { %858 = vmatprep.subr.bf16.mxu0 %v940_v0  ;;  %864 = vmatprep.subr.bf16.mxu1 %v940_v0  ;;  %s839_s17 = sshll.u32 %s1068_s16, 6  ;;  %s838_s18 = sshll.u32 %s1068_s16, 5  ;;  %vm537_vm4 = vcmask 1044480  }
   0xd   : > { %860 = vmatprep.mubr.msk.bf16.mxu0 %vm941_vm0, %v940_v0  ;;  %866 = vmatprep.mubr.msk.bf16.mxu1 %vm941_vm0, %v940_v0  ;;  %s240_s21 = scalar_lea.vmem %s1063_s1, %s839_s17  ;;  %s235_s24 = scalar_lea.vmem %s1062_s0, %s838_s18 }
   0xe   : > { %v264_v1 = vld [vmem:[%s240_s21] sm:$0xff]  ;;  %v265_v2 = vld [vmem:[%s240_s21 + $0x8] sm:$0x3]  ;;  %v266_v3 = vld [vmem:[%s240_s21 + $0x10] sm:$0xff]  ;;  %s825_s25 = sshll.u32 %s1068_s16, 3  ;;  %s245_s5 = scalar_lea.vmem %s1064_s2, %s839_s17 }
   0xf   : > { %v285_v4 = vpack.c.bf16 %v265_v2, %v264_v1  ;;  %v267_v5 = vld [vmem:[%s240_s21 + $0x18] sm:$0x3]  ;;  %v256_v6 = vld [vmem:[%s235_s24] sm:$0xff]  ;;  %v257_v7 = vld [vmem:[%s235_s24 + $0x8] sm:$0xff]  ;;  %s249_s28 = scalar_lea.vmem %s1065_s3, %s825_s25  ;;  %s254_s8 = scalar_lea.vmem %s1066_s4, %s838_s18 }
  0x10   : > { %v286_v8 = vpack.c.bf16 %v267_v5, %v266_v3  ;;  %v260_v9 = vmul.f32 0.35355338, %v256_v6  ;;  %v268_v10 = vld [vmem:[%s240_s21 + $0x20] sm:$0xff]  ;;  %v269_v12 = vld [vmem:[%s240_s21 + $0x28] sm:$0x3]  ;;  %v270_v13 = vld [vmem:[%s240_s21 + $0x30] sm:$0xff] }
  0x11   : > { %v294_v11 = vsel %vm289_vm1, %v285_v4, 0  ;;  %v271_v14 = vld [vmem:[%s240_s21 + $0x38] sm:$0x3]  ;;  %v261_v16 = vmul.f32 0.35355338, %v257_v7  ;;  %v287_v17 = vpack.c.bf16 %v269_v12, %v268_v10  ;;  %v258_v21 = vld [vmem:[%s235_s24 + $0x10] sm:$0xff] }
  0x12   : > { %859 = vmatpush3.bf16.xpose.msra.mxu0 %v294_v11  ;;  %v340_v15 = vsel %vm289_vm1, %v286_v8, 0  ;;  %v288_v18 = vpack.c.bf16 %v271_v14, %v270_v13  ;;  %v281_v19 = vpack.c.bf16 %v260_v9, %v260_v9  ;;  %v259_v23 = vld [vmem:[%s235_s24 + $0x18] sm:$0xff]  ;;  %v262_v25 = vmul.f32 0.35355338, %v258_v21  ;;  %v280_v29 = vld [vmem:[%s249_s28] sm:$0xff]  ;;  %v274_v13 = vld [vmem:[%s245_s5 + $0x10] sm:$0xff] }
  0x13   : > { %865 = vmatpush3.bf16.xpose.msra.mxu1 %v340_v15  ;;  %870 = vmatprep.subr.bf16.mxu0 %v940_v0  ;;  %v282_v20 = vpack.c.bf16 %v261_v16, %v261_v16  ;;  %v386_v22 = vsel %vm289_vm1, %v287_v17, 0  ;;  %v263_v26 = vmul.f32 0.35355338, %v259_v23  ;;  %vm474_vm2 = vcmp.eq.f32.partialorder %v280_v29, 0.0  ;;  %v272_v11 = vld [vmem:[%s245_s5] sm:$0xff] }
  0x14   : > { %876 = vmatprep.subr.bf16.mxu1 %v940_v0  ;;  %v432_v24 = vsel %vm289_vm1, %v288_v18, 0  ;;  %v283_v27 = vpack.c.bf16 %v262_v25, %v262_v25  ;;  %v273_v12 = vld [vmem:[%s245_s5 + $0x8] sm:$0x3]  ;;  %v275_v15 = vld [vmem:[%s245_s5 + $0x18] sm:$0x3] }
  0x15   : > { %v284_v28 = vpack.c.bf16 %v263_v26, %v263_v26  ;;  %v530_v14 = vpack.c.bf16 %v273_v12, %v272_v11  ;;  %v531_v16 = vpack.c.bf16 %v275_v15, %v274_v13  ;;  %v279_v23 = vld [vmem:[%s245_s5 + $0x38] sm:$0x3] }
  0x17   : > { %v539_v17 = vsel %vm537_vm4, %v530_v14, 0  ;;  %v585_v18 = vsel %vm537_vm4, %v531_v16, 0 }
  0x19   : > { %861 = vmatmul.mubr.msk.bf16.vlgmr.msra.gmra.mxu0 %vm289_vm1, %v281_v19  ;;  %v276_v19 = vld [vmem:[%s245_s5 + $0x20] sm:$0xff] }
  0x1a   : > { %867 = vmatmul.mubr.msk.bf16.vlgmr.msra.gmra.mxu1 %vm289_vm1, %v282_v20  ;;  %871 = vmatpush3.bf16.xpose.msra.mxu0 %v386_v22  ;;  %v277_v20 = vld [vmem:[%s245_s5 + $0x28] sm:$0x3]  ;;  %v278_v22 = vld [vmem:[%s245_s5 + $0x30] sm:$0xff] }
  0x1b   : > { %877 = vmatpush3.bf16.xpose.msra.mxu1 %v432_v24  ;;  %872 = vmatprep.mubr.msk.bf16.mxu0 %vm941_vm0, %v940_v0  ;;  %v532_v21 = vpack.c.bf16 %v277_v20, %v276_v19  ;;  %v533_v25 = vpack.c.bf16 %v279_v23, %v278_v22 }
  0x1c   : > { %878 = vmatprep.mubr.msk.bf16.mxu1 %vm941_vm0, %v940_v0  ;;  %882 = vmatprep.subr.bf16.mxu0 %v940_v0 }
  0x1d   : > { %888 = vmatprep.subr.bf16.mxu1 %v940_v0  ;;  %v631_v24 = vsel %vm537_vm4, %v532_v21, 0  ;;  %v677_v26 = vsel %vm537_vm4, %v533_v25, 0 }
  0x21   : > { %873 = vmatmul.mubr.msk.bf16.vlgmr.msra.gmra.mxu0 %vm289_vm1, %v283_v27 }
  0x22   : > { %879 = vmatmul.mubr.msk.bf16.vlgmr.msra.gmra.mxu1 %vm289_vm1, %v284_v28  ;;  %884 = vmatprep.mubr.msk.bf16.mxu0 %vm941_vm0, %v940_v0 }
  0x23   : > { %890 = vmatprep.mubr.msk.bf16.mxu1 %vm941_vm0, %v940_v0  ;;  %883 = vmatpush3.bf16.msra.mxu0 %v539_v17 }
  0x24   : > { %889 = vmatpush3.bf16.msra.mxu1 %v585_v18  ;;  %894 = vmatprep.subr.bf16.mxu0 %v940_v0 }
  0x25   : > { %900 = vmatprep.subr.bf16.mxu1 %v940_v0 }
  0xd9   : > { %v330_v30 = vpop.f32.mrf.mxu0 }
  0xda   : > { %v477_v31 = vsel %vm474_vm2, -1e+10, %v330_v30  ;;  %v376_v32 = vpop.f32.mrf.mxu1 }
  0xdb   : > { %v478_v33 = vsel %vm474_vm2, -1e+10, %v376_v32  ;;  %v862_v34 = vpop.f32.mrf.mxu0  ;;  %v482_v35 = vsel %vm481_vm3, %v477_v31, -inf }
  0xdc   : > { %v868_v36 = vpop.f32.mrf.mxu1  ;;  %483 = vmax.xlane.f32.xlu0 %v482_v35  ;;  %v485_v38 = vsel %vm481_vm3, %v478_v33, -inf }
  0xdd   : > { %v333_v37 = vpop.f32.mrf.mxu0 }
  0xde   : > { %v379_v39 = vpop.f32.mrf.mxu1 }
  0xdf   : > { %v863_v40 = vpop.f32.mrf.mxu0 }
  0xe0   : > { %v869_v41 = vpop.f32.mrf.mxu1  ;;  %486 = vmax.xlane.f32.xlu0 %v485_v38 }
  0xe1   : > { %v422_v42 = vpop.f32.mrf.mxu0 }
  0xe2   : > { %v479_v43 = vsel %vm474_vm2, -1e+10, %v422_v42  ;;  %v468_v44 = vpop.f32.mrf.mxu1 }
  0xe3   : > { %v480_v45 = vsel %vm474_vm2, -1e+10, %v468_v44  ;;  %v874_v46 = vpop.f32.mrf.mxu0  ;;  %v488_v47 = vsel %vm481_vm3, %v479_v43, -inf }
  0xe4   : > { %v880_v48 = vpop.f32.mrf.mxu1  ;;  %489 = vmax.xlane.f32.xlu1 %v488_v47  ;;  %v491_v50 = vsel %vm481_vm3, %v480_v45, -inf }
  0xe5   : > { %v425_v49 = vpop.f32.mrf.mxu0 }
  0xe6   : > { %v471_v51 = vpop.f32.mrf.mxu1 }
  0xe7   : > { %v875_v52 = vpop.f32.mrf.mxu0 }
  0xe8   : > { %v881_v53 = vpop.f32.mrf.mxu1  ;;  %492 = vmax.xlane.f32.xlu1 %v491_v50 }
 0x165   : > { %v484_v54 = vpop.xlane.xlu0 %483 }
 0x166   : > { %v494_v55 = vsub.f32 %v477_v31, %v484_v54 }
 0x168   : > { %v498_v56 = vmul.f32 1.442695, %v494_v55 }
 0x169   : > { %v487_v57 = vpop.xlane.xlu0 %486 }
 0x16a   : > { %916 = vpow2.f32 %v498_v56  ;;  %v495_v58 = vsub.f32 %v478_v33, %v487_v57 }
 0x16c   : > { %v500_v59 = vmul.f32 1.442695, %v495_v58 }
 0x16d   : > { %v490_v60 = vpop.xlane.xlu1 %489 }
 0x16e   : > { %918 = vpow2.f32 %v500_v59  ;;  %v496_v61 = vsub.f32 %v479_v43, %v490_v60 }
 0x170   : > { %v502_v62 = vmul.f32 1.442695, %v496_v61 }
 0x171   : > { %v493_v63 = vpop.xlane.xlu1 %492 }
 0x172   : > { %920 = vpow2.f32 %v502_v62  ;;  %v497_v1 = vsub.f32 %v480_v45, %v493_v63 }
 0x174   : > { %v504_v2 = vmul.f32 1.442695, %v497_v1 }
 0x176   : > { %922 = vpow2.f32 %v504_v2 }
 0x177   : > { %v917_v3 = vpop.eup %916 }
 0x178   : > { %v506_v4 = vsel %vm481_vm3, %v917_v3, 0.0 }
 0x179   : > { %507 = vadd.xlane.f32.xlu0 %v506_v4 }
 0x17b   : > { %v919_v5 = vpop.eup %918 }
 0x17c   : > { %v509_v6 = vsel %vm481_vm3, %v919_v5, 0.0 }
 0x17d   : > { %510 = vadd.xlane.f32.xlu1 %v509_v6 }
 0x17f   : > { %v921_v7 = vpop.eup %920 }
 0x180   : > { %v512_v8 = vsel %vm481_vm3, %v921_v7, 0.0 }
 0x181   : > { %513 = vadd.xlane.f32.xlu0 %v512_v8 }
 0x183   : > { %v923_v9 = vpop.eup %922 }
 0x184   : > { %v515_v10 = vsel %vm481_vm3, %v923_v9, 0.0 }
 0x185   : > { %516 = vadd.xlane.f32.xlu1 %v515_v10 }
 0x202   : > { %v508_v27 = vpop.xlane.xlu0 %507 }
 0x203   : > { %924 = vrcp.f32 %v508_v27 }
 0x206   : > { %v511_v28 = vpop.xlane.xlu1 %510 }
 0x207   : > { %926 = vrcp.f32 %v511_v28 }
 0x20a   : > { %v514_v29 = vpop.xlane.xlu0 %513 }
 0x20b   : > { %928 = vrcp.f32 %v514_v29 }
 0x20e   : > { %v517_v30 = vpop.xlane.xlu1 %516 }
 0x20f   : > { %930 = vrcp.f32 %v517_v30 }
 0x210   : > { %v925_v31 = vpop.eup %924 }
 0x211   : > { %v522_v32 = vmul.f32 %v925_v31, %v917_v3 }
 0x213   : > { %v526_v33 = vpack.c.bf16 %v522_v32, %v522_v32 }
 0x214   : > { %v927_v34 = vpop.eup %926 }
 0x215   : > { %885 = vmatmul.mubr.msk.bf16.vlgmr.msra.gmra.mxu0 %vm481_vm3, %v526_v33  ;;  %v523_v35 = vmul.f32 %v927_v34, %v919_v5 }
 0x216   : > { %895 = vmatpush3.bf16.msra.mxu0 %v631_v24  ;;  %896 = vmatprep.mubr.msk.bf16.mxu0 %vm941_vm0, %v940_v0 }
 0x217   : > { %v527_v36 = vpack.c.bf16 %v523_v35, %v523_v35 }
 0x218   : > { %v929_v37 = vpop.eup %928 }
 0x219   : > { %891 = vmatmul.mubr.msk.bf16.vlgmr.msra.gmra.mxu1 %vm481_vm3, %v527_v36  ;;  %v524_v38 = vmul.f32 %v929_v37, %v921_v7 }
 0x21a   : > { %901 = vmatpush3.bf16.msra.mxu1 %v677_v26  ;;  %902 = vmatprep.mubr.msk.bf16.mxu1 %vm941_vm0, %v940_v0 }
 0x21b   : > { %v528_v39 = vpack.c.bf16 %v524_v38, %v524_v38 }
 0x21c   : > { %v931_v40 = vpop.eup %930 }
 0x21d   : > { %897 = vmatmul.mubr.msk.bf16.vlgmr.msra.gmra.mxu0 %vm481_vm3, %v528_v39  ;;  %v525_v41 = vmul.f32 %v931_v40, %v923_v9 }
 0x21f   : > { %v529_v42 = vpack.c.bf16 %v525_v41, %v525_v41 }
 0x221   : > { %903 = vmatmul.mubr.msk.bf16.vlgmr.msra.gmra.mxu1 %vm481_vm3, %v529_v42 }
 0x2d5   : > { %v575_v43 = vpop.f32.mrf.mxu0 }
 0x2d6   : > { %719 = vst.msk [vmem:[%s254_s8] sm:$0xff] %vm289_vm1, %v575_v43 }
 0x2d7   : > { %v886_v44 = vpop.f32.mrf.mxu0 }
 0x2d9   : > { %v578_v45 = vpop.f32.mrf.mxu0  ;;  %v621_v46 = vpop.f32.mrf.mxu1 }
 0x2da   : > { %720 = vst.msk [vmem:[%s254_s8 + $0x8] sm:$0xff] %vm289_vm1, %v621_v46 }
 0x2db   : > { %v887_v0 = vpop.f32.mrf.mxu0  ;;  %v892_v47 = vpop.f32.mrf.mxu1 }
 0x2dd   : > { %v624_v48 = vpop.f32.mrf.mxu1  ;;  %v667_v49 = vpop.f32.mrf.mxu0 }
 0x2de   : > { %721 = vst.msk [vmem:[%s254_s8 + $0x10] sm:$0xff] %vm289_vm1, %v667_v49 }
 0x2df   : > { %v893_v50 = vpop.f32.mrf.mxu1  ;;  %v898_v51 = vpop.f32.mrf.mxu0 }
 0x2e1   : > { %v670_v52 = vpop.f32.mrf.mxu0  ;;  %v713_v53 = vpop.f32.mrf.mxu1 }
 0x2e2   : > { %722 = vst.msk [vmem:[%s254_s8 + $0x18] sm:$0xff] %vm289_vm1, %v713_v53 }
 0x2e3   : > { %v899_v54 = vpop.f32.mrf.mxu0  ;;  %v904_v55 = vpop.f32.mrf.mxu1 }
 0x2e5   : > { %v716_v56 = vpop.f32.mrf.mxu1 }
 0x2e7   : > { %v905_v57 = vpop.f32.mrf.mxu1 }
 0x2e8 PF: > { %s14_s15 = sadd.s32 1, %s938_s15  }
 0x2e9   : > { %p11_p4 = scmp.ge.s32.totalorder %s14_s15, 4  }
 0x2eb   :  { %13 = sbr.rel (!%p11_p4) target bundleno = 1 (0x1), region = 75 }

// kernel: decoder_forward.24
= control target key start
LH: loop header
LB: loop body
LE: loop exit
PB: predicated region body
PF: predicated region fallthrough
CT: control target
= control target key end

     0   :  { %v248_v0 = vmov 0.0   ;;  %vm249_vm0 = vmmov 0   ;;  %vm43_vm1 = vcmask 261120   ;;  %vm110_vm2 = vcmask 523264   ;;  %s357_s1 = inlined_call_operand.vmem [shape: f32[32,64], index: 1, kind: input, shape index: {}]   ;;  %s358_s3 = inlined_call_operand.vmem [shape: f32[64,32], index: 3, kind: input, shape index: {}]   ;;  %s359_s0 = inlined_call_operand.vmem [shape: f32[16,32], index: 0, kind: input, shape index: {}]   ;;  %s360_s2 = inlined_call_operand.vmem [shape: f32[1,64], index: 2, kind: input, shape index: {}]   ;;  %s361_s4 = inlined_call_operand.vmem [shape: f32[1,32], index: 4, kind: input, shape index: {}]   ;;  %s362_s5 = inlined_call_operand.vmem [shape: f32[1,32], index: 5, kind: input, shape index: {}]   ;;  %s363_s6 = inlined_call_operand.vmem [shape: f32[1,32], index: 6, kind: input, shape index: {}]   ;;  %s364_s7 = inlined_call_operand.vmem [shape: f32[16,32], index: 7, kind: output, shape index: {}]  }
   0x1   :  { %222 = vmatprep.subr.bf16.mxu0 %v248_v0  ;;  %v32_v1 = vld [vmem:[%s357_s1 + $0x10] sm:$0xff]  ;;  %v33_v2 = vld [vmem:[%s357_s1 + $0x18] sm:$0xff]  ;;  %v30_v3 = vld [vmem:[%s357_s1] sm:$0xff]  ;;  %226 = vmatprep.mubr.msk.bf16.mxu0 %vm249_vm0, %v248_v0 }
   0x2   :  { %v35_v4 = vpack.c.bf16 %v33_v2, %v32_v1  ;;  %v31_v5 = vld [vmem:[%s357_s1 + $0x8] sm:$0xff]  ;;  %230 = vmatprep.subr.bf16.mxu1 %v248_v0  ;;  %238 = vmatprep.mubr.msk.bf16.mxu1 %vm249_vm0, %v248_v0  ;;  %v97_v6 = vld [vmem:[%s358_s3 + $0x30] sm:$0xff]  ;;  %v98_v7 = vld [vmem:[%s358_s3 + $0x38] sm:$0xff] }
   0x3   :  { %v34_v8 = vpack.c.bf16 %v31_v5, %v30_v3  ;;  %v27_v9 = vld [vmem:[%s359_s0] sm:$0xff]  ;;  %v28_v10 = vld [vmem:[%s359_s0 + $0x8] sm:$0xff]  ;;  %v102_v11 = vpack.c.bf16 %v98_v7, %v97_v6  ;;  %v93_v16 = vld [vmem:[%s358_s3 + $0x10] sm:$0xff] }
   0x4   :  { %223 = vmatpush3.bf16.msra.mxu0 %v35_v4  ;;  %v29_v12 = vpack.c.bf16 %v28_v10, %v27_v9  ;;  %v95_v13 = vld [vmem:[%s358_s3 + $0x20] sm:$0xff]  ;;  %v96_v14 = vld [vmem:[%s358_s3 + $0x28] sm:$0xff]  ;;  %v94_v17 = vld [vmem:[%s358_s3 + $0x18] sm:$0xff] }
   0x5   :  { %224 = vmatprep.subr.bf16.mxu0 %v248_v0  ;;  %231 = vmatpush3.bf16.msra.mxu1 %v102_v11  ;;  %v101_v15 = vpack.c.bf16 %v96_v14, %v95_v13  ;;  %v100_v18 = vpack.c.bf16 %v94_v17, %v93_v16  ;;  %v91_v19 = vld [vmem:[%s358_s3] sm:$0xff]  ;;  %v92_v20 = vld [vmem:[%s358_s3 + $0x8] sm:$0xff] }
   0x6   :  { %232 = vmatprep.subr.bf16.mxu1 %v248_v0  ;;  %v99_v21 = vpack.c.bf16 %v92_v20, %v91_v19  ;;  %v208_v22 = vld [vmem:[%s360_s2] ss:$0 sm:$0xff] }
   0x7   :  { %v210_v32 = vld [vmem:[%s361_s4] ss:$0 sm:$0xff] }
   0x8   :  { %225 = vmatpush3.bf16.msra.mxu0 %v34_v8  ;;  %v212_v60 = vld [vmem:[%s362_s5] ss:$0 sm:$0xff] }
   0x9   :  { %233 = vmatpush3.bf16.msra.mxu1 %v101_v15  ;;  %v213_v62 = vld [vmem:[%s363_s6] ss:$0 sm:$0xff] }
   0xa   :  { %234 = vmatprep.subr.bf16.mxu1 %v248_v0 }
   0xb   :  { %227 = vmatmul.mubr.msk.bf16.vlgmr.msra.gmra.mxu0 %vm43_vm1, %v29_v12 }
   0xd   :  { %235 = vmatpush3.bf16.msra.mxu1 %v100_v18 }
   0xe   :  { %236 = vmatprep.subr.bf16.mxu1 %v248_v0 }
  0x11   :  { %237 = vmatpush3.bf16.msra.mxu1 %v99_v21 }
  0xcb   :  { %v81_v23 = vpop.f32.mrf.mxu0 }
  0xcc   :  { %v82_v25 = vadd.f32 %v208_v22, %v81_v23 }
  0xcd   :  { %v228_v24 = vpop.f32.mrf.mxu0 }
  0xce   :  { %v88_v29 = vmax.f32 %v82_v25, 0.0 }
  0xcf   :  { %v84_v26 = vpop.f32.mrf.mxu0 }
  0xd0   :  { %v85_v27 = vadd.f32 %v208_v22, %v84_v26 }
  0xd1   :  { %v229_v28 = vpop.f32.mrf.mxu0 }
  0xd2   :  { %v89_v30 = vmax.f32 %v85_v27, 0.0 }
  0xd4   :  { %v90_v31 = vpack.c.bf16 %v89_v30, %v88_v29 }
  0xd6   :  { %239 = vmatmul.mubr.msk.bf16.vlgmr.msra.gmra.mxu1 %vm110_vm2, %v90_v31 }
 0x196   :  { %v148_v33 = vpop.f32.mrf.mxu1 }
 0x197   :  { %v149_v34 = vadd.f32 %v210_v32, %v148_v33 }
 0x198   :  { %v240_v35 = vpop.f32.mrf.mxu1 }
 0x199   :  { %v155_v36 = vadd.f32 %v149_v34, %v27_v9 }
 0x19a   :  { %v151_v37 = vpop.f32.mrf.mxu1 }
 0x19b   :  { %v152_v38 = vadd.f32 %v210_v32, %v151_v37  ;;  %v157_v39 = vsel %vm43_vm1, %v155_v36, 0.0 }
 0x19c   :  { %158 = vadd.xlane.f32.xlu0 %v157_v39  ;;  %v241_v40 = vpop.f32.mrf.mxu1 }
 0x19d   :  { %v156_v41 = vadd.f32 %v152_v38, %v28_v10 }
 0x19f   :  { %v160_v42 = vsel %vm43_vm1, %v156_v41, 0.0 }
 0x1a0   :  { %161 = vadd.xlane.f32.xlu0 %v160_v42 }
 0x225   :  { %v159_v43 = vpop.xlane.xlu0 %158 }
 0x226   :  { %v164_v44 = vmul.f32 0.03125, %v159_v43 }
 0x228   :  { %v166_v45 = vsub.f32 %v155_v36, %v164_v44 }
 0x229   :  { %v162_v46 = vpop.xlane.xlu0 %161 }
 0x22a   :  { %v165_v47 = vmul.f32 0.03125, %v162_v46  ;;  %v168_v48 = vmul.f32 %v166_v45, %v166_v45 }
 0x22c   :  { %v167_v49 = vsub.f32 %v156_v41, %v165_v47  ;;  %v170_v50 = vsel %vm43_vm1, %v168_v48, 0.0 }
 0x22d   :  { %171 = vadd.xlane.f32.xlu1 %v170_v50 }
 0x22e   :  { %v169_v51 = vmul.f32 %v167_v49, %v167_v49 }
 0x230   :  { %v173_v52 = vsel %vm43_vm1, %v169_v51, 0.0 }
 0x231   :  { %174 = vadd.xlane.f32.xlu1 %v173_v52 }
 0x2b6   :  { %v172_v53 = vpop.xlane.xlu1 %171 }
 0x2b7   :  { %v176_v54 = vmul.f32 0.03125, %v172_v53 }
 0x2b9   :  { %v178_v55 = vadd.f32 1e-05, %v176_v54 }
 0x2ba   :  { %v175_v56 = vpop.xlane.xlu1 %174 }
 0x2bb   :  { %244 = vrsqrt.f32 %v178_v55  ;;  %v177_v57 = vmul.f32 0.03125, %v175_v56 }
 0x2bd   :  { %v179_v58 = vadd.f32 1e-05, %v177_v57 }
 0x2bf   :  { %246 = vrsqrt.f32 %v179_v58 }
 0x2c8   :  { %v245_v59 = vpop.eup %244 }
 0x2c9   :  { %v182_v61 = vmul.f32 %v245_v59, %v166_v45 }
 0x2cb   :  { %v191_v63 = vmul.f32 %v212_v60, %v182_v61 }
 0x2cc   :  { %v247_v0 = vpop.eup %246 }
 0x2cd   :  { %v200_v1 = vadd.f32 %v213_v62, %v191_v63  ;;  %v183_v2 = vmul.f32 %v247_v0, %v167_v49 }
 0x2cf   :  { %202 = vst.msk [vmem:[%s364_s7] sm:$0xff] %vm43_vm1, %v200_v1  ;;  %v192_v3 = vmul.f32 %v212_v60, %v183_v2 }
 0x2d1   :  { %v201_v4 = vadd.f32 %v213_v62, %v192_v3 }
 0x2d3   :  { %203 = vst.msk [vmem:[%s364_s7 + $0x8] sm:$0xff] %vm43_vm1, %v201_v4 }

// kernel: decoder_forward.30
= control target key start
LH: loop header
LB: loop body
LE: loop exit
PB: predicated region body
PF: predicated region fallthrough
CT: control target
= control target key end

     0   :  { %11 = vsyncpa [#allocation3], 0  ;;  %s1353_s0 = inlined_call_operand.vmem [shape: f32[2,4,8,8], index: 0, kind: input, shape index: {}]   ;;  %s1354_s1 = inlined_call_operand.vmem [shape: f32[2,4,10,8], index: 1, kind: input, shape index: {}]   ;;  %s1355_s2 = inlined_call_operand.vmem [shape: f32[2,4,10,8], index: 2, kind: input, shape index: {}]   ;;  %s1356_s3 = inlined_call_operand.vmem [shape: f32[2,1,8,10], index: 3, kind: input, shape index: {}]   ;;  %s1357_s4 = inlined_call_operand.vmem [shape: f32[2,4,8,8], index: 4, kind: output, shape index: {0}]   ;;  %s1358_s5 = inlined_call_operand.hbm [shape: f32[2,4,8,10], index: 5, kind: output, shape index: {1}]  }
   0x1   :  { %13 = vsyncpa [#allocation3 + $0x1], 0  ;;  %s1162_s18 = smov 0   ;;  %s1164_s19 = smov 0  }
   0x2   :  { %s1166_s20 = smov 0   ;;  %s1168_s21 = smov 0  }
   0x3 LB: > { %s1183_s22 = sadd.s32 4294967295, %s1125_s21   ;;  %s910_s23 = sadd.s32 4294967294, %s1125_s21   ;;  %s1125_s21 = sphi %s1168_s21, %s1364_s21   ;;  %s1121_s20 = sphi %s1166_s20, %s1363_s20   ;;  %s1117_s19 = sphi %s1164_s19, %s1362_s19   ;;  %s1113_s18 = sphi %s1162_s18, %s1361_s18  }
   0x4   : > { %s1187_s24 = sadd.s32 1, %s1125_s21   ;;  %s156_s25 = sadd.s32 1, %s1121_s20 }
   0x5   : > { %s153_s26 = ssub.s32 %s1125_s21, %s1187_s24  ;;  %p166_p0 = scmp.ne.s32.totalorder %s1121_s20, %s1117_s19 }
   0x6   : > { %p154_p1 = scmp.eq.s32.totalorder %s153_s26, 0  ;;  %p167_p2 = scmp.eq.s32.totalorder %s1183_s22, 1 }
   0x7   : > { %p172_p3 = scmp.ne.s32.totalorder %s1117_s19, %s1113_s18  ;;  %p173_p4 = scmp.eq.s32.totalorder %s910_s23, 1 }
   0x8   : > { %s1198_s27 = scalar_select %p154_p1, %s1121_s20, %s156_s25  }
   0x9   : > { %p1200_p5 = por %p167_p2, %p166_p0  ;;  %p1204_p6 = por %p173_p4, %p172_p3 }
   0xa   : > { %p913_p7 = scmp.ge.s32.totalorder %s1125_s21, 1  ;;  %p222_p8 = scmp.lt.s32.totalorder %s1125_s21, 3 }
   0xc   : > { %p223_p9 = pnand %p913_p7, %p222_p8 }
   0xd   : > { %p269_p10 = scmp.lt.s32.totalorder (!%p223_p9), %s1183_s22, 1 }
   0xe   : > { %226 = sbr.rel (%p223_p9) target bundleno = 753 (0x2f1), region = 36 }
  0x13   : > { %v1127_v0 = vmov 0.0   ;;  %s1214_s30 = scalar_select %p269_p10, %s1183_s22, 1  ;;  %vm1128_vm0 = vmmov 0   ;;  %vm327_vm1 = vcmask 64512   ;;  %vm519_vm3 = vcmask 80896  }
  0x14   : > { %958 = vmatprep.subr.bf16.mxu0 %v1127_v0  ;;  %964 = vmatprep.subr.bf16.mxu1 %v1127_v0  ;;  %vm579_vm4 = vcmask 1044480  }
  0x15   : > { %960 = vmatprep.mubr.msk.bf16.mxu0 %vm1128_vm0, %v1127_v0  ;;  %966 = vmatprep.mubr.msk.bf16.mxu1 %vm1128_vm0, %v1127_v0  ;;  %s938_s6 = sshll.u32 %s1214_s30, 6  ;;  %s937_s7 = sshll.u32 %s1214_s30, 5 }
  0x16   : > { %s278_s10 = scalar_lea.vmem %s1354_s1, %s938_s6  ;;  %s273_s13 = scalar_lea.vmem %s1353_s0, %s937_s7 }
  0x17   : > { %v302_v1 = vld [vmem:[%s278_s10] sm:$0xff]  ;;  %v303_v2 = vld [vmem:[%s278_s10 + $0x8] sm:$0x3]  ;;  %v304_v3 = vld [vmem:[%s278_s10 + $0x10] sm:$0xff]  ;;  %s921_s14 = sshll.u32 %s1214_s30, 3  ;;  %s283_s26 = scalar_lea.vmem %s1355_s2, %s938_s6 }
  0x18   : > { %v323_v4 = vpack.c.bf16 %v303_v2, %v302_v1  ;;  %v305_v5 = vld [vmem:[%s278_s10 + $0x18] sm:$0x3]  ;;  %v294_v6 = vld [vmem:[%s273_s13] sm:$0xff]  ;;  %v295_v7 = vld [vmem:[%s273_s13 + $0x8] sm:$0xff]  ;;  %s287_s17 = scalar_lea.vmem %s1356_s3, %s921_s14  ;;  %s266_s6 = sand.u32 1, %s1117_s19  }
  0x19   : > { %v324_v8 = vpack.c.bf16 %v305_v5, %v304_v3  ;;  %v298_v9 = vmul.f32 0.35355338, %v294_v6  ;;  %v306_v10 = vld [vmem:[%s278_s10 + $0x20] sm:$0xff]  ;;  %v307_v12 = vld [vmem:[%s278_s10 + $0x28] sm:$0x3]  ;;  %v308_v13 = vld [vmem:[%s278_s10 + $0x30] sm:$0xff] }
  0x1a   : > { %v332_v11 = vsel %vm327_vm1, %v323_v4, 0  ;;  %v309_v14 = vld [vmem:[%s278_s10 + $0x38] sm:$0x3]  ;;  %v299_v16 = vmul.f32 0.35355338, %v295_v7  ;;  %v325_v17 = vpack.c.bf16 %v307_v12, %v306_v10  ;;  %v296_v21 = vld [vmem:[%s273_s13 + $0x10] sm:$0xff] }
  0x1b   : > { %959 = vmatpush3.bf16.xpose.msra.mxu0 %v332_v11  ;;  %v378_v15 = vsel %vm327_vm1, %v324_v8, 0  ;;  %v326_v18 = vpack.c.bf16 %v309_v14, %v308_v13  ;;  %v319_v19 = vpack.c.bf16 %v298_v9, %v298_v9  ;;  %v297_v23 = vld [vmem:[%s273_s13 + $0x18] sm:$0xff]  ;;  %v300_v25 = vmul.f32 0.35355338, %v296_v21  ;;  %v318_v29 = vld [vmem:[%s287_s17] sm:$0xff]  ;;  %s914_s8 = sshll.u32 %s266_s6, 5 }
  0x1c   : > { %965 = vmatpush3.bf16.xpose.msra.mxu1 %v378_v15  ;;  %970 = vmatprep.subr.bf16.mxu0 %v1127_v0  ;;  %v320_v20 = vpack.c.bf16 %v299_v16, %v299_v16  ;;  %v424_v22 = vsel %vm327_vm1, %v325_v17, 0  ;;  %v301_v26 = vmul.f32 0.35355338, %v297_v23  ;;  %vm512_vm2 = vcmp.eq.f32.partialorder %v318_v29, 0.0  ;;  %v310_v11 = vld [vmem:[%s283_s26] sm:$0xff]  ;;  %v312_v15 = vld [vmem:[%s283_s26 + $0x10] sm:$0xff] }
  0x1d   : > { %976 = vmatprep.subr.bf16.mxu1 %v1127_v0  ;;  %v470_v24 = vsel %vm327_vm1, %v326_v18, 0  ;;  %v321_v27 = vpack.c.bf16 %v300_v25, %v300_v25  ;;  %v311_v12 = vld [vmem:[%s283_s26 + $0x8] sm:$0x3]  ;;  %v313_v16 = vld [vmem:[%s283_s26 + $0x18] sm:$0x3]  ;;  %v316_v23 = vld [vmem:[%s283_s26 + $0x30] sm:$0xff] }
  0x1e   : > { %v322_v28 = vpack.c.bf16 %v301_v26, %v301_v26  ;;  %v572_v13 = vpack.c.bf16 %v311_v12, %v310_v11  ;;  %v573_v17 = vpack.c.bf16 %v313_v16, %v312_v15  ;;  %s268_s9 = scalar_lea.vmem [#allocation2], %s914_s8  ;;  %s941_s10 = sshll.u32 %s1183_s22, 9 }
  0x1f   : > { %s787_s11 = sshll.u32 %s268_s9, 4  ;;  %s1298_s14 = scalar_lea.hbm %s1358_s5, %s941_s10  ;;  %s1300_s11 = int_to_ptr.vmem [resolvable:$true] %s787_s11 }
  0x20   : > { %v581_v14 = vsel %vm579_vm4, %v572_v13, 0  ;;  %v627_v18 = vsel %vm579_vm4, %v573_v17, 0  ;;  %s1304_s15 = scalar_lea.sflag [#allocation3], %s266_s6  ;;  %s1065_s16 = scalar_lea.vmem %s1300_s11, 512 }
  0x21   : > { %p1066_p11 = scmp.ne.s32.totalorder %s1300_s11, %s1065_s16  ;;  %s1129_s22 = smov [#allocation2]  }
  0x22   : > { %961 = vmatmul.mubr.msk.bf16.vlgmr.msra.gmra.mxu0 %vm327_vm1, %v319_v19  ;;  %v314_v19 = vld [vmem:[%s283_s26 + $0x20] sm:$0xff]  ;;  %s1069_s17 = sshll.u32 %s1129_s22, 4  ;;  %s1070_s17 = int_to_ptr.vmem [resolvable:$false] %s1069_s17 }
  0x23   : > { %967 = vmatmul.mubr.msk.bf16.vlgmr.msra.gmra.mxu1 %vm327_vm1, %v320_v20  ;;  %971 = vmatpush3.bf16.xpose.msra.mxu0 %v424_v22  ;;  %v315_v20 = vld [vmem:[%s283_s26 + $0x28] sm:$0x3]  ;;  %p1067_p12 = pnand %p1066_p11, %p1200_p5  ;;  %s1071_s23 = scalar_lea.vmem %s1070_s17, 1024 }
  0x24   : > { %977 = vmatpush3.bf16.xpose.msra.mxu1 %v470_v24  ;;  %972 = vmatprep.mubr.msk.bf16.mxu0 %vm1128_vm0, %v1127_v0  ;;  %v574_v21 = vpack.c.bf16 %v315_v20, %v314_v19  ;;  %v317_v24 = vld [vmem:[%s283_s26 + $0x38] sm:$0x3]  ;;  %p1072_p0 = scmp.lt.s32.totalorder %s1300_s11, %s1070_s17  ;;  %p1073_p1 = scmp.lt.s32.totalorder %s1071_s23, %s1065_s16 }
  0x25   : > { %978 = vmatprep.mubr.msk.bf16.mxu1 %vm1128_vm0, %v1127_v0  ;;  %982 = vmatprep.subr.bf16.mxu0 %v1127_v0  ;;  %v575_v25 = vpack.c.bf16 %v317_v24, %v316_v23  ;;  %p1068_p13 = pneg %p1067_p12 }
  0x26   : > { %988 = vmatprep.subr.bf16.mxu1 %v1127_v0  ;;  %v673_v22 = vsel %vm579_vm4, %v574_v21, 0  ;;  %p1074_p2 = por %p1073_p1, %p1072_p0 }
  0x27   : > { %v719_v26 = vsel %vm579_vm4, %v575_v25, 0 }
  0x28   : > { %p1075_p3 = pnand %p1074_p2, %p1068_p13 }
  0x2a   : > { %973 = vmatmul.mubr.msk.bf16.vlgmr.msra.gmra.mxu0 %vm327_vm1, %v321_v27 }
  0x2b   : > { %979 = vmatmul.mubr.msk.bf16.vlgmr.msra.gmra.mxu1 %vm327_vm1, %v322_v28  ;;  %984 = vmatprep.mubr.msk.bf16.mxu0 %vm1128_vm0, %v1127_v0 }
  0x2c   : > { %990 = vmatprep.mubr.msk.bf16.mxu1 %vm1128_vm0, %v1127_v0  ;;  %983 = vmatpush3.bf16.msra.mxu0 %v581_v14 }
  0x2d   : > { %994 = vmatprep.subr.bf16.mxu0 %v1127_v0  ;;  %989 = vmatpush3.bf16.msra.mxu1 %v627_v18 }
  0x2e   : > { %1000 = vmatprep.subr.bf16.mxu1 %v1127_v0 }
  0xe2   : > { %v368_v30 = vpop.f32.mrf.mxu0 }
  0xe3   : > { %v515_v31 = vsel %vm512_vm2, -1e+10, %v368_v30  ;;  %v414_v32 = vpop.f32.mrf.mxu1 }
  0xe4   : > { %v516_v33 = vsel %vm512_vm2, -1e+10, %v414_v32  ;;  %v962_v34 = vpop.f32.mrf.mxu0  ;;  %v520_v35 = vsel %vm519_vm3, %v515_v31, -inf }
  0xe5   : > { %v968_v36 = vpop.f32.mrf.mxu1  ;;  %521 = vmax.xlane.f32.xlu0 %v520_v35  ;;  %v523_v38 = vsel %vm519_vm3, %v516_v33, -inf }
  0xe6   : > { %v371_v37 = vpop.f32.mrf.mxu0 }
  0xe7   : > { %v417_v39 = vpop.f32.mrf.mxu1 }
  0xe8   : > { %v963_v40 = vpop.f32.mrf.mxu0 }
  0xe9   : > { %v969_v41 = vpop.f32.mrf.mxu1  ;;  %524 = vmax.xlane.f32.xlu0 %v523_v38 }
  0xea   : > { %v460_v42 = vpop.f32.mrf.mxu0 }
  0xeb   : > { %v517_v43 = vsel %vm512_vm2, -1e+10, %v460_v42  ;;  %v506_v44 = vpop.f32.mrf.mxu1 }
  0xec   : > { %v518_v45 = vsel %vm512_vm2, -1e+10, %v506_v44  ;;  %v974_v46 = vpop.f32.mrf.mxu0  ;;  %v526_v47 = vsel %vm519_vm3, %v517_v43, -inf }
  0xed   : > { %v980_v48 = vpop.f32.mrf.mxu1  ;;  %527 = vmax.xlane.f32.xlu1 %v526_v47  ;;  %v529_v50 = vsel %vm519_vm3, %v518_v45, -inf }
  0xee   : > { %v463_v49 = vpop.f32.mrf.mxu0 }
  0xef   : > { %v509_v51 = vpop.f32.mrf.mxu1 }
  0xf0   : > { %v975_v52 = vpop.f32.mrf.mxu0 }
  0xf1   : > { %v981_v53 = vpop.f32.mrf.mxu1  ;;  %530 = vmax.xlane.f32.xlu1 %v529_v50 }
 0x16e   : > { %v522_v54 = vpop.xlane.xlu0 %521 }
 0x16f   : > { %v532_v55 = vsub.f32 %v515_v31, %v522_v54 }
 0x171   : > { %v536_v56 = vmul.f32 1.442695, %v532_v55 }
 0x172   : > { %v525_v57 = vpop.xlane.xlu0 %524 }
 0x173   : > { %1049 = vpow2.f32 %v536_v56  ;;  %v533_v58 = vsub.f32 %v516_v33, %v525_v57 }
 0x175   : > { %v538_v59 = vmul.f32 1.442695, %v533_v58 }
 0x176   : > { %v528_v60 = vpop.xlane.xlu1 %527 }
 0x177   : > { %1051 = vpow2.f32 %v538_v59  ;;  %v534_v61 = vsub.f32 %v517_v43, %v528_v60 }
 0x179   : > { %v540_v62 = vmul.f32 1.442695, %v534_v61 }
 0x17a   : > { %v531_v63 = vpop.xlane.xlu1 %530 }
 0x17b   : > { %1053 = vpow2.f32 %v540_v62  ;;  %v535_v1 = vsub.f32 %v518_v45, %v531_v63 }
 0x17d   : > { %v542_v2 = vmul.f32 1.442695, %v535_v1 }
 0x17f   : > { %1055 = vpow2.f32 %v542_v2 }
 0x180   : > { %v1050_v3 = vpop.eup %1049 }
 0x181   : > { %v544_v4 = vsel %vm519_vm3, %v1050_v3, 0.0 }
 0x182   : > { %545 = vadd.xlane.f32.xlu0 %v544_v4 }
 0x184   : > { %v1052_v5 = vpop.eup %1051 }
 0x185   : > { %v547_v6 = vsel %vm519_vm3, %v1052_v5, 0.0 }
 0x186   : > { %548 = vadd.xlane.f32.xlu1 %v547_v6 }
 0x188   : > { %v1054_v7 = vpop.eup %1053 }
 0x189   : > { %v550_v8 = vsel %vm519_vm3, %v1054_v7, 0.0 }
 0x18a   : > { %551 = vadd.xlane.f32.xlu0 %v550_v8 }
 0x18c   : > { %v1056_v9 = vpop.eup %1055 }
 0x18d   : > { %v553_v10 = vsel %vm519_vm3, %v1056_v9, 0.0 }
 0x18e   : > { %554 = vadd.xlane.f32.xlu1 %v553_v10 }
 0x20b   : > { %v546_v27 = vpop.xlane.xlu0 %545 }
 0x20c   : > { %1057 = vrcp.f32 %v546_v27 }
 0x20f   : > { %v549_v28 = vpop.xlane.xlu1 %548 }
 0x210   : > { %1059 = vrcp.f32 %v549_v28 }
 0x213   : > { %v552_v29 = vpop.xlane.xlu0 %551 }
 0x214   : > { %1061 = vrcp.f32 %v552_v29 }
 0x217   : > { %v555_v30 = vpop.xlane.xlu1 %554 }
 0x218   : > { %1063 = vrcp.f32 %v555_v30 }
 0x219   : > { %v1058_v31 = vpop.eup %1057 }
 0x21a   : > { %v560_v32 = vmul.f32 %v1058_v31, %v1050_v3 }
 0x21c   : > { %564 = vst.msk [vmem:[%s268_s9] sm:$0xff] %vm519_vm3, %v560_v32  ;;  %v568_v33 = vpack.c.bf16 %v560_v32, %v560_v32 }
 0x21d   : > { %v1060_v34 = vpop.eup %1059 }
 0x21e   : > { %985 = vmatmul.mubr.msk.bf16.vlgmr.msra.gmra.mxu0 %vm519_vm3, %v568_v33  ;;  %v561_v35 = vmul.f32 %v1060_v34, %v1052_v5 }
 0x21f   : > { %995 = vmatpush3.bf16.msra.mxu0 %v673_v22  ;;  %996 = vmatprep.mubr.msk.bf16.mxu0 %vm1128_vm0, %v1127_v0 }
 0x220   : > { %565 = vst.msk [vmem:[%s268_s9 + $0x8] sm:$0xff] %vm519_vm3, %v561_v35  ;;  %v569_v36 = vpack.c.bf16 %v561_v35, %v561_v35 }
 0x221   : > { %v1062_v37 = vpop.eup %1061 }
 0x222   : > { %v562_v38 = vmul.f32 %v1062_v37, %v1054_v7  ;;  %991 = vmatmul.mubr.msk.bf16.vlgmr.msra.gmra.mxu1 %vm519_vm3, %v569_v36 }
 0x223   : > { %1001 = vmatpush3.bf16.msra.mxu1 %v719_v26  ;;  %1002 = vmatprep.mubr.msk.bf16.mxu1 %vm1128_vm0, %v1127_v0 }
 0x224   : > { %566 = vst.msk [vmem:[%s268_s9 + $0x10] sm:$0xff] %vm519_vm3, %v562_v38  ;;  %v570_v39 = vpack.c.bf16 %v562_v38, %v562_v38 }
 0x225   : > { %v1064_v40 = vpop.eup %1063 }
 0x226   : > { %v563_v41 = vmul.f32 %v1064_v40, %v1056_v9  ;;  %997 = vmatmul.mubr.msk.bf16.vlgmr.msra.gmra.mxu0 %vm519_vm3, %v570_v39 }
 0x228   : > { %567 = vst.msk [vmem:[%s268_s9 + $0x18] sm:$0xff] %vm519_vm3, %v563_v41  ;;  %v571_v42 = vpack.c.bf16 %v563_v41, %v563_v41 }
 0x22a   : > { %1003 = vmatmul.mubr.msk.bf16.vlgmr.msra.gmra.mxu1 %vm519_vm3, %v571_v42 }
 0x22b   : > { %1078 = shalt.err (!%p1075_p3)
}
 0x22c   : > { %s1079_s25 = scalar_lea.hbm %s1298_s14, 512  ;;  %s1083_s8 = scalar_lea.hbm %s1358_s5, 1024 }
 0x22d   : > { %p1080_p4 = scmp.ne.s32.totalorder %s1298_s14, %s1079_s25  ;;  %p1084_p9 = scmp.lt.s32.totalorder %s1298_s14, %s1358_s5 }
 0x22e   : > { %p1085_p10 = scmp.lt.s32.totalorder %s1083_s8, %s1079_s25 }
 0x22f   : > { %p1081_p7 = pnand %p1080_p4, %p1200_p5 }
 0x230   : > { %p1086_p11 = por %p1085_p10, %p1084_p9 }
 0x231   : > { %p1082_p8 = pneg %p1081_p7 }
 0x233   : > { %p1087_p12 = pnand %p1086_p11, %p1082_p8 }
 0x235   : > { %1090 = shalt.err (!%p1087_p12)
}
 0x236   : > { %s1130_s12 = smov 128   ;;  %s1131_s13 = smov 8  }
 0x237   : > { %1006 = dma.vmem_to_hbm [thread:$0]  (%p1200_p5), %s1300_s11, 512, %s1298_s14, %s1304_s15, %s1130_s12, %s1130_s12, %s1131_s13  }
 0x238   : > { %s292_s17 = scalar_lea.vmem %s1357_s4, %s937_s7 }
 0x2de   : > { %v617_v0 = vpop.f32.mrf.mxu0 }
 0x2df   : > { %761 = vst.msk [vmem:[%s292_s17] sm:$0xff] %vm327_vm1, %v617_v0 }
 0x2e0   : > { %v986_v43 = vpop.f32.mrf.mxu0 }
 0x2e2   : > { %v620_v44 = vpop.f32.mrf.mxu0  ;;  %v663_v45 = vpop.f32.mrf.mxu1 }
 0x2e3   : > { %762 = vst.msk [vmem:[%s292_s17 + $0x8] sm:$0xff] %vm327_vm1, %v663_v45 }
 0x2e4   : > { %v987_v46 = vpop.f32.mrf.mxu0  ;;  %v992_v47 = vpop.f32.mrf.mxu1 }
 0x2e6   : > { %v666_v48 = vpop.f32.mrf.mxu1  ;;  %v709_v49 = vpop.f32.mrf.mxu0 }
 0x2e7   : > { %763 = vst.msk [vmem:[%s292_s17 + $0x10] sm:$0xff] %vm327_vm1, %v709_v49 }
 0x2e8   : > { %v993_v50 = vpop.f32.mrf.mxu1  ;;  %v998_v51 = vpop.f32.mrf.mxu0 }
 0x2ea   : > { %v712_v52 = vpop.f32.mrf.mxu0  ;;  %v755_v53 = vpop.f32.mrf.mxu1 }
 0x2eb   : > { %764 = vst.msk [vmem:[%s292_s17 + $0x18] sm:$0xff] %vm327_vm1, %v755_v53 }
 0x2ec   : > { %v999_v54 = vpop.f32.mrf.mxu0  ;;  %v1004_v55 = vpop.f32.mrf.mxu1 }
 0x2ee   : > { %v758_v56 = vpop.f32.mrf.mxu1 }
 0x2f0   : > { %v1005_v57 = vpop.f32.mrf.mxu1 }
 0x2f1 PF: > { %p1012_p5 = scmp.ge.s32.totalorder %s1125_s21, 2  ;;  %s810_s28 = sand.u32 1, %s1113_s18  }
 0x2f2   : > { %s811_s30 = scalar_lea.sflag [#allocation3], %s810_s28 }
 0x2f3   : > { %p1009_p13 = pnand %p1012_p5, %p1204_p6 }
 0x2f5   : > { %p1010_p0 = pneg %p1009_p13 }
 0x2f7   : > { %1108 = dma.done.wait (%p1010_p0), %s811_s30, 512  }
 0x2f8   : > { %1110 = vsyncadd (%p1010_p0), %s811_s30, 4294966784  ;;  %p16_p1 = scmp.ge.s32.totalorder %s1187_s24, 4   ;;  %s1361_s18 = smov %s1117_s19 }
 0x2f9   : > { %s1362_s19 = smov %s1121_s20  ;;  %s1363_s20 = smov %s1198_s27 }
 0x2fa   : > { %s1364_s21 = smov %s1187_s24  ;;  %18 = sbr.rel (!%p16_p1) target bundleno = 3 (0x3), region = 92 }
 0x2ff   :  { %816 = vsyncpa [#allocation3], 1 }
 0x300   :  { %818 = vsyncpa [#allocation3 + $0x1], 1 }

// kernel: decoder_forward.33
= control target key start
LH: loop header
LB: loop body
LE: loop exit
PB: predicated region body
PF: predicated region fallthrough
CT: control target
= control target key end

     0   :  { %v116_v0 = vmov 0.0   ;;  %vm117_vm0 = vmmov 0   ;;  %vm32_vm1 = vcmask 261120   ;;  %s165_s1 = inlined_call_operand.vmem [shape: f32[32,128], index: 1, kind: input, shape index: {}]   ;;  %s166_s0 = inlined_call_operand.vmem [shape: f32[16,32], index: 0, kind: input, shape index: {}]   ;;  %s167_s2 = inlined_call_operand.vmem [shape: f32[1,128], index: 2, kind: input, shape index: {}]   ;;  %s168_s3 = inlined_call_operand.vmem [shape: f32[16,128], index: 3, kind: output, shape index: {}]  }
   0x1   :  { %106 = vmatprep.subr.bf16.mxu0 %v116_v0  ;;  %v28_v1 = vld [vmem:[%s165_s1 + $0x10] sm:$0xff]  ;;  %v29_v2 = vld [vmem:[%s165_s1 + $0x18] sm:$0xff]  ;;  %v26_v3 = vld [vmem:[%s165_s1] sm:$0xff]  ;;  %110 = vmatprep.mubr.msk.bf16.mxu0 %vm117_vm0, %v116_v0 }
   0x2   :  { %v31_v4 = vpack.c.bf16 %v29_v2, %v28_v1  ;;  %v27_v5 = vld [vmem:[%s165_s1 + $0x8] sm:$0xff]  ;;  %v23_v7 = vld [vmem:[%s166_s0] sm:$0xff] }
   0x3   :  { %v30_v6 = vpack.c.bf16 %v27_v5, %v26_v3  ;;  %v24_v8 = vld [vmem:[%s166_s0 + $0x8] sm:$0xff]  ;;  %v102_v10 = vld [vmem:[%s167_s2] ss:$0 sm:$0xff] }
   0x4   :  { %107 = vmatpush3.bf16.msra.mxu0 %v31_v4  ;;  %v25_v9 = vpack.c.bf16 %v24_v8, %v23_v7 }
   0x5   :  { %108 = vmatprep.subr.bf16.mxu0 %v116_v0 }
   0x8   :  { %109 = vmatpush3.bf16.msra.mxu0 %v30_v6 }
   0xb   :  { %111 = vmatmul.mubr.msk.bf16.vlgmr.msra.gmra.mxu0 %vm32_vm1, %v25_v9 }
  0xcb   :  { %v70_v11 = vpop.f32.mrf.mxu0 }
  0xcc   :  { %v93_v12 = vadd.f32 %v102_v10, %v70_v11 }
  0xcd   :  { %v112_v13 = vpop.f32.mrf.mxu0 }
  0xce   :  { %95 = vst [vmem:[%s168_s3] sm:$0xff] %v93_v12 }
  0xcf   :  { %v73_v14 = vpop.f32.mrf.mxu0 }
  0xd0   :  { %v94_v15 = vadd.f32 %v102_v10, %v73_v14 }
  0xd1   :  { %v113_v16 = vpop.f32.mrf.mxu0 }
  0xd2   :  { %96 = vst [vmem:[%s168_s3 + $0x8] sm:$0xff] %v94_v15 }

</bundles_post_ra>
